<compile_context>
chip_gen: v6e
topology: v6e:2x2x1
jax: 0.10.0
libtpu: 0.0.40
codegen_flags: <defaults>
</compile_context>

<pallas_src>
import jax
import jax.numpy as jnp
from jax.experimental import pallas as pl
from jax.experimental.pallas import tpu as pltpu

# Original PyTorch layer sizes (in, out) and post-linear activations.
LAYER_DIMS = [(768, 128), (128, 64), (64, 12), (12, 3),
              (3, 12), (12, 64), (64, 128), (128, 768)]
ACTIVATIONS = ["relu", "relu", "relu", "none",   # encoder (bare Linear at latent)
               "relu", "relu", "relu", "tanh"]   # decoder

# Layers actually run inside the kernel: layers 3 & 4 are fused on the host into a
# single 12->12 layer (no activation sits between them in the PyTorch module).
KERNEL_LAYER_DIMS = [(768, 128), (128, 64), (64, 12), (12, 12),
                     (12, 64), (64, 128), (128, 768)]
KERNEL_ACTIVATIONS = ["relu", "relu", "relu", "relu", "relu", "relu", "tanh"]


def _apply_act(h, act):
    if act == "relu":
        return jnp.maximum(h, 0.0)
    if act == "tanh":
        return jnp.tanh(h)
    return h


def _make_kernel(ew_dtype):
    """Build the MLP kernel with element-wise math in `ew_dtype` (bf16 on v6e/v7x,
    f32 on v5e and older).  MXU dots are always bf16 operands / f32 accumulation."""

    def kernel(x_ref, *refs):
        # refs = (w0, b0, w1, b1, ..., w6, b6, out_ref)
        out_ref = refs[-1]
        param_refs = refs[:-1]
        h = x_ref[...]                                   # (bm, 768), bf16 or f32
        for li, act in enumerate(KERNEL_ACTIVATIONS):
            w = param_refs[2 * li][...]                  # (din, dout) bf16
            b = param_refs[2 * li + 1][...]              # (1, dout) ew_dtype
            y = jnp.dot(h.astype(jnp.bfloat16), w,
                        preferred_element_type=jnp.float32)
            h = _apply_act(y.astype(ew_dtype) + b, act)  # bias/ReLU/Tanh on VPU/EUP
        out_ref[...] = h.astype(out_ref.dtype)

    return kernel


def _default_elementwise_dtype():
    """bf16 element-wise math on chips with a bf16 VPU/EUP (v6e, v7x); f32 otherwise."""
    try:
        kind = jax.devices()[0].device_kind.lower()
    except Exception:
        return jnp.float32
    if any(v in kind for v in ("v2", "v3", "v4", "v5")):
        return jnp.float32
    return jnp.bfloat16


def _pick_block_rows(B, bm):
    """Batch tile: as large as requested (capped at 1024) for HBM-roofline efficiency,
    but keep >= 2 grid steps when possible so both v7x TensorCores get work.  Rounded
    to a multiple of 16 (bf16 sublane packing)."""
    bm = max(16, min(int(bm), 1024))
    bm = (bm // 16) * 16
    if pl.cdiv(B, bm) < 2:                    # single grid step -> half of v7x idles
        bm = max(16, ((pl.cdiv(B, 2) + 15) // 16) * 16)
    return bm


def autoencoder_forward(x, params, *, bm=512, out_dtype=jnp.bfloat16,
                        elementwise_dtype=None):
    """Forward pass of the autoencoder.

    x:      (B, 768), float32 or bfloat16 (bf16 halves the read-side HBM traffic).
    params: flat list [w0, b0, ..., w7, b7]; w_i is (in, out), b_i is (1, out), f32.
    bm:     batch tile; 512 default (fits v5e's 16 MiB default scoped VMEM with no
            override).  v6e callers with B >= a few thousand can pass 1024.
    """
    B, D = x.shape
    assert D == 768
    if elementwise_dtype is None:
        elementwise_dtype = _default_elementwise_dtype()

    # --- host-side param prep: fuse layers 3 & 4, cast weights to bf16 ----------
    (w0, b0, w1, b1, w2, b2, w3, b3,
     w4, b4, w5, b5, w6, b6, w7, b7) = params
    w34 = w3 @ w4                                    # (12,3)@(3,12) -> (12,12)
    b34 = b3 @ w4 + b4                               # (1,12)
    kernel_params = []
    for (w, b) in [(w0, b0), (w1, b1), (w2, b2), (w34, b34),
                   (w5, b5), (w6, b6), (w7, b7)]:
        kernel_params.append(w.astype(jnp.bfloat16))
        kernel_params.append(b.astype(elementwise_dtype))

    # --- grid: no host-side pad / slice; Pallas masks the ragged last tile ------
    bm = _pick_block_rows(B, bm)
    grid_b = pl.cdiv(B, bm)

    in_specs = [pl.BlockSpec((bm, D), lambda i: (i, 0))]
    for (din, dout) in KERNEL_LAYER_DIMS:
        # Full weight / bias blocks with constant index maps -> VMEM-resident,
        # re-fetch skipped across grid steps.
        in_specs.append(pl.BlockSpec((din, dout), lambda i: (0, 0)))
        in_specs.append(pl.BlockSpec((1, dout), lambda i: (0, 0)))
    out_spec = pl.BlockSpec((bm, D), lambda i: (i, 0))

    return pl.pallas_call(
        _make_kernel(elementwise_dtype),
        out_shape=jax.ShapeDtypeStruct((B, D), out_dtype),
        grid_spec=pltpu.PrefetchScalarGridSpec(
            num_scalar_prefetch=0,
            grid=(grid_b,),
            in_specs=in_specs,
            out_specs=out_spec,
        ),
        compiler_params=pltpu.CompilerParams(
            dimension_semantics=("parallel",)),      # batch axis shards across TCs (v7x)
    )(x, *kernel_params)


def init_params(key):
    """Deterministic init mimicking PyTorch nn.Linear default (U[-1/sqrt(in), 1/sqrt(in)])."""
    params = []
    for li, (din, dout) in enumerate(LAYER_DIMS):
        kw, kb = jax.random.split(jax.random.fold_in(key, li))
        bound = 1.0 / (din ** 0.5)
        w = jax.random.uniform(kw, (din, dout), jnp.float32, -bound, bound)
        b = jax.random.uniform(kb, (1, dout), jnp.float32, -bound, bound)
        params += [w, b]
    return params


def reference_forward(x, params):
    """Pure-JAX f32 reference of the original (unfused) 8-layer module."""
    h = x
    for li, act in enumerate(ACTIVATIONS):
        h = h @ params[2 * li] + params[2 * li + 1]
        h = _apply_act(h, act)
    return h


if __name__ == "__main__":
    key = jax.random.PRNGKey(0)
    kx, kp = jax.random.split(key)

    B = 200                      # non-multiple of the tile: exercises the ragged path
    x = jax.random.normal(kx, (B, 768), jnp.float32)
    params = init_params(kp)

    # Pass bf16 input (halves read-side HBM traffic); kernel accepts f32 too.
    out = autoencoder_forward(x.astype(jnp.bfloat16), params)
    out = jax.block_until_ready(out)

    ref = reference_forward(x, params)
    assert out.shape == (B, 768)
    assert out.dtype == jnp.bfloat16
    # bf16 MXU operands, bf16 I/O and the host-side layer-3/4 fusion -> relaxed
    # tolerance vs the f32 reference.
    assert jnp.allclose(out.astype(jnp.float32), ref, atol=4e-2, rtol=4e-2), \
        "mismatch vs JAX reference"

    print("KERNEL_OK")
</pallas_src>

<mosaic_0001>
module attributes {stable_mosaic.version = 11 : i64} {
  func.func @kernel(%arg0: i32, %arg1: memref<112x768xbf16, #tpu.memory_space<vmem>>, %arg2: memref<768x128xbf16, #tpu.memory_space<vmem>>, %arg3: memref<1x128xbf16, #tpu.memory_space<vmem>>, %arg4: memref<128x64xbf16, #tpu.memory_space<vmem>>, %arg5: memref<1x64xbf16, #tpu.memory_space<vmem>>, %arg6: memref<64x12xbf16, #tpu.memory_space<vmem>>, %arg7: memref<1x12xbf16, #tpu.memory_space<vmem>>, %arg8: memref<12x12xbf16, #tpu.memory_space<vmem>>, %arg9: memref<1x12xbf16, #tpu.memory_space<vmem>>, %arg10: memref<12x64xbf16, #tpu.memory_space<vmem>>, %arg11: memref<1x64xbf16, #tpu.memory_space<vmem>>, %arg12: memref<64x128xbf16, #tpu.memory_space<vmem>>, %arg13: memref<1x128xbf16, #tpu.memory_space<vmem>>, %arg14: memref<128x768xbf16, #tpu.memory_space<vmem>>, %arg15: memref<1x768xbf16, #tpu.memory_space<vmem>>, %arg16: memref<112x768xbf16, #tpu.memory_space<vmem>>) attributes {dimension_semantics = [#tpu.dimension_semantics<parallel>], iteration_bounds = array<i64: 2>, scalar_prefetch = 0 : i64, scratch_operands = 0 : i64, tpu.core_type = #tpu.core_type<tc>, window_params = [{transform_indices = @transform_0, window_bounds = array<i64: 112, 768>}, {pipeline_mode = #tpu.pipeline_mode<synchronous>, transform_indices = @transform_1, window_bounds = array<i64: 768, 128>}, {pipeline_mode = #tpu.pipeline_mode<synchronous>, transform_indices = @transform_2, window_bounds = array<i64: 1, 128>}, {pipeline_mode = #tpu.pipeline_mode<synchronous>, transform_indices = @transform_3, window_bounds = array<i64: 128, 64>}, {pipeline_mode = #tpu.pipeline_mode<synchronous>, transform_indices = @transform_4, window_bounds = array<i64: 1, 64>}, {pipeline_mode = #tpu.pipeline_mode<synchronous>, transform_indices = @transform_5, window_bounds = array<i64: 64, 12>}, {pipeline_mode = #tpu.pipeline_mode<synchronous>, transform_indices = @transform_6, window_bounds = array<i64: 1, 12>}, {pipeline_mode = #tpu.pipeline_mode<synchronous>, transform_indices = @transform_7, window_bounds = array<i64: 12, 12>}, {pipeline_mode = #tpu.pipeline_mode<synchronous>, transform_indices = @transform_8, window_bounds = array<i64: 1, 12>}, {pipeline_mode = #tpu.pipeline_mode<synchronous>, transform_indices = @transform_9, window_bounds = array<i64: 12, 64>}, {pipeline_mode = #tpu.pipeline_mode<synchronous>, transform_indices = @transform_10, window_bounds = array<i64: 1, 64>}, {pipeline_mode = #tpu.pipeline_mode<synchronous>, transform_indices = @transform_11, window_bounds = array<i64: 64, 128>}, {pipeline_mode = #tpu.pipeline_mode<synchronous>, transform_indices = @transform_12, window_bounds = array<i64: 1, 128>}, {pipeline_mode = #tpu.pipeline_mode<synchronous>, transform_indices = @transform_13, window_bounds = array<i64: 128, 768>}, {pipeline_mode = #tpu.pipeline_mode<synchronous>, transform_indices = @transform_14, window_bounds = array<i64: 1, 768>}, {transform_indices = @transform_15, window_bounds = array<i64: 112, 768>}]} {
    %c0 = arith.constant 0 : index
    %c0_0 = arith.constant 0 : index
    %0 = vector.load %arg1[%c0, %c0_0] : memref<112x768xbf16, #tpu.memory_space<vmem>>, vector<112x768xbf16>
    %c0_1 = arith.constant 0 : index
    %c0_2 = arith.constant 0 : index
    %1 = vector.load %arg2[%c0_1, %c0_2] : memref<768x128xbf16, #tpu.memory_space<vmem>>, vector<768x128xbf16>
    %c0_3 = arith.constant 0 : index
    %c0_4 = arith.constant 0 : index
    %2 = vector.load %arg3[%c0_3, %c0_4] : memref<1x128xbf16, #tpu.memory_space<vmem>>, vector<1x128xbf16>
    %cst = arith.constant dense<0.000000e+00> : vector<112x128xf32>
    %3 = tpu.matmul %0, %1, %cst {dimension_numbers = #tpu.dot_dimension_numbers<[1], [0], [0], [1], [0, 0, 1, 1], [], []>} : vector<112x768xbf16>, vector<768x128xbf16>, vector<112x128xf32> -> vector<112x128xf32>
    %4 = arith.truncf %3 : vector<112x128xf32> to vector<112x128xbf16>
    %5 = vector.broadcast %2 : vector<1x128xbf16> to vector<112x128xbf16>
    %6 = arith.addf %4, %5 : vector<112x128xbf16>
    %cst_5 = arith.constant 0.000000e+00 : bf16
    %7 = vector.broadcast %cst_5 : bf16 to vector<112x128xbf16>
    %8 = arith.maximumf %6, %7 : vector<112x128xbf16>
    %c0_6 = arith.constant 0 : index
    %c0_7 = arith.constant 0 : index
    %9 = vector.load %arg4[%c0_6, %c0_7] : memref<128x64xbf16, #tpu.memory_space<vmem>>, vector<128x64xbf16>
    %c0_8 = arith.constant 0 : index
    %c0_9 = arith.constant 0 : index
    %10 = vector.load %arg5[%c0_8, %c0_9] : memref<1x64xbf16, #tpu.memory_space<vmem>>, vector<1x64xbf16>
    %cst_10 = arith.constant dense<0.000000e+00> : vector<112x64xf32>
    %11 = tpu.matmul %8, %9, %cst_10 {dimension_numbers = #tpu.dot_dimension_numbers<[1], [0], [0], [1], [0, 0, 1, 1], [], []>} : vector<112x128xbf16>, vector<128x64xbf16>, vector<112x64xf32> -> vector<112x64xf32>
    %12 = arith.truncf %11 : vector<112x64xf32> to vector<112x64xbf16>
    %13 = vector.broadcast %10 : vector<1x64xbf16> to vector<112x64xbf16>
    %14 = arith.addf %12, %13 : vector<112x64xbf16>
    %cst_11 = arith.constant 0.000000e+00 : bf16
    %15 = vector.broadcast %cst_11 : bf16 to vector<112x64xbf16>
    %16 = arith.maximumf %14, %15 : vector<112x64xbf16>
    %c0_12 = arith.constant 0 : index
    %c0_13 = arith.constant 0 : index
    %17 = vector.load %arg6[%c0_12, %c0_13] : memref<64x12xbf16, #tpu.memory_space<vmem>>, vector<64x12xbf16>
    %c0_14 = arith.constant 0 : index
    %c0_15 = arith.constant 0 : index
    %18 = vector.load %arg7[%c0_14, %c0_15] : memref<1x12xbf16, #tpu.memory_space<vmem>>, vector<1x12xbf16>
    %cst_16 = arith.constant dense<0.000000e+00> : vector<112x12xf32>
    %19 = tpu.matmul %16, %17, %cst_16 {dimension_numbers = #tpu.dot_dimension_numbers<[1], [0], [0], [1], [0, 0, 1, 1], [], []>} : vector<112x64xbf16>, vector<64x12xbf16>, vector<112x12xf32> -> vector<112x12xf32>
    %20 = arith.truncf %19 : vector<112x12xf32> to vector<112x12xbf16>
    %21 = vector.broadcast %18 : vector<1x12xbf16> to vector<112x12xbf16>
    %22 = arith.addf %20, %21 : vector<112x12xbf16>
    %cst_17 = arith.constant 0.000000e+00 : bf16
    %23 = vector.broadcast %cst_17 : bf16 to vector<112x12xbf16>
    %24 = arith.maximumf %22, %23 : vector<112x12xbf16>
    %c0_18 = arith.constant 0 : index
    %c0_19 = arith.constant 0 : index
    %25 = vector.load %arg8[%c0_18, %c0_19] : memref<12x12xbf16, #tpu.memory_space<vmem>>, vector<12x12xbf16>
    %c0_20 = arith.constant 0 : index
    %c0_21 = arith.constant 0 : index
    %26 = vector.load %arg9[%c0_20, %c0_21] : memref<1x12xbf16, #tpu.memory_space<vmem>>, vector<1x12xbf16>
    %cst_22 = arith.constant dense<0.000000e+00> : vector<112x12xf32>
    %27 = tpu.matmul %24, %25, %cst_22 {dimension_numbers = #tpu.dot_dimension_numbers<[1], [0], [0], [1], [0, 0, 1, 1], [], []>} : vector<112x12xbf16>, vector<12x12xbf16>, vector<112x12xf32> -> vector<112x12xf32>
    %28 = arith.truncf %27 : vector<112x12xf32> to vector<112x12xbf16>
    %29 = vector.broadcast %26 : vector<1x12xbf16> to vector<112x12xbf16>
    %30 = arith.addf %28, %29 : vector<112x12xbf16>
    %cst_23 = arith.constant 0.000000e+00 : bf16
    %31 = vector.broadcast %cst_23 : bf16 to vector<112x12xbf16>
    %32 = arith.maximumf %30, %31 : vector<112x12xbf16>
    %c0_24 = arith.constant 0 : index
    %c0_25 = arith.constant 0 : index
    %33 = vector.load %arg10[%c0_24, %c0_25] : memref<12x64xbf16, #tpu.memory_space<vmem>>, vector<12x64xbf16>
    %c0_26 = arith.constant 0 : index
    %c0_27 = arith.constant 0 : index
    %34 = vector.load %arg11[%c0_26, %c0_27] : memref<1x64xbf16, #tpu.memory_space<vmem>>, vector<1x64xbf16>
    %cst_28 = arith.constant dense<0.000000e+00> : vector<112x64xf32>
    %35 = tpu.matmul %32, %33, %cst_28 {dimension_numbers = #tpu.dot_dimension_numbers<[1], [0], [0], [1], [0, 0, 1, 1], [], []>} : vector<112x12xbf16>, vector<12x64xbf16>, vector<112x64xf32> -> vector<112x64xf32>
    %36 = arith.truncf %35 : vector<112x64xf32> to vector<112x64xbf16>
    %37 = vector.broadcast %34 : vector<1x64xbf16> to vector<112x64xbf16>
    %38 = arith.addf %36, %37 : vector<112x64xbf16>
    %cst_29 = arith.constant 0.000000e+00 : bf16
    %39 = vector.broadcast %cst_29 : bf16 to vector<112x64xbf16>
    %40 = arith.maximumf %38, %39 : vector<112x64xbf16>
    %c0_30 = arith.constant 0 : index
    %c0_31 = arith.constant 0 : index
    %41 = vector.load %arg12[%c0_30, %c0_31] : memref<64x128xbf16, #tpu.memory_space<vmem>>, vector<64x128xbf16>
    %c0_32 = arith.constant 0 : index
    %c0_33 = arith.constant 0 : index
    %42 = vector.load %arg13[%c0_32, %c0_33] : memref<1x128xbf16, #tpu.memory_space<vmem>>, vector<1x128xbf16>
    %cst_34 = arith.constant dense<0.000000e+00> : vector<112x128xf32>
    %43 = tpu.matmul %40, %41, %cst_34 {dimension_numbers = #tpu.dot_dimension_numbers<[1], [0], [0], [1], [0, 0, 1, 1], [], []>} : vector<112x64xbf16>, vector<64x128xbf16>, vector<112x128xf32> -> vector<112x128xf32>
    %44 = arith.truncf %43 : vector<112x128xf32> to vector<112x128xbf16>
    %45 = vector.broadcast %42 : vector<1x128xbf16> to vector<112x128xbf16>
    %46 = arith.addf %44, %45 : vector<112x128xbf16>
    %cst_35 = arith.constant 0.000000e+00 : bf16
    %47 = vector.broadcast %cst_35 : bf16 to vector<112x128xbf16>
    %48 = arith.maximumf %46, %47 : vector<112x128xbf16>
    %c0_36 = arith.constant 0 : index
    %c0_37 = arith.constant 0 : index
    %49 = vector.load %arg14[%c0_36, %c0_37] : memref<128x768xbf16, #tpu.memory_space<vmem>>, vector<128x768xbf16>
    %c0_38 = arith.constant 0 : index
    %c0_39 = arith.constant 0 : index
    %50 = vector.load %arg15[%c0_38, %c0_39] : memref<1x768xbf16, #tpu.memory_space<vmem>>, vector<1x768xbf16>
    %cst_40 = arith.constant dense<0.000000e+00> : vector<112x768xf32>
    %51 = tpu.matmul %48, %49, %cst_40 {dimension_numbers = #tpu.dot_dimension_numbers<[1], [0], [0], [1], [0, 0, 1, 1], [], []>} : vector<112x128xbf16>, vector<128x768xbf16>, vector<112x768xf32> -> vector<112x768xf32>
    %52 = arith.truncf %51 : vector<112x768xf32> to vector<112x768xbf16>
    %53 = vector.broadcast %50 : vector<1x768xbf16> to vector<112x768xbf16>
    %54 = arith.addf %52, %53 : vector<112x768xbf16>
    %55 = math.tanh %54 : vector<112x768xbf16>
    %c0_41 = arith.constant 0 : index
    %c0_42 = arith.constant 0 : index
    %56 = vector.load %arg16[%c0_41, %c0_42] : memref<112x768xbf16, #tpu.memory_space<vmem>>, vector<112x768xbf16>
    tpu.vector_store %arg16[%c0_41, %c0_42], %55 {strides = array<i32>} : memref<112x768xbf16, #tpu.memory_space<vmem>>, vector<112x768xbf16>,
    return
  }
  func.func @transform_0(%arg0: i32) -> (i32, i32) {
    %c0_i32 = arith.constant 0 : i32
    %c0_i32_0 = arith.constant 0 : i32
    return %arg0, %c0_i32 : i32, i32
  }
  func.func @transform_1(%arg0: i32) -> (i32, i32) {
    %c0_i32 = arith.constant 0 : i32
    %c0_i32_0 = arith.constant 0 : i32
    %c0_i32_1 = arith.constant 0 : i32
    return %c0_i32, %c0_i32_0 : i32, i32
  }
  func.func @transform_2(%arg0: i32) -> (i32, i32) {
    %c0_i32 = arith.constant 0 : i32
    %c0_i32_0 = arith.constant 0 : i32
    %c0_i32_1 = arith.constant 0 : i32
    return %c0_i32, %c0_i32_0 : i32, i32
  }
  func.func @transform_3(%arg0: i32) -> (i32, i32) {
    %c0_i32 = arith.constant 0 : i32
    %c0_i32_0 = arith.constant 0 : i32
    %c0_i32_1 = arith.constant 0 : i32
    return %c0_i32, %c0_i32_0 : i32, i32
  }
  func.func @transform_4(%arg0: i32) -> (i32, i32) {
    %c0_i32 = arith.constant 0 : i32
    %c0_i32_0 = arith.constant 0 : i32
    %c0_i32_1 = arith.constant 0 : i32
    return %c0_i32, %c0_i32_0 : i32, i32
  }
  func.func @transform_5(%arg0: i32) -> (i32, i32) {
    %c0_i32 = arith.constant 0 : i32
    %c0_i32_0 = arith.constant 0 : i32
    %c0_i32_1 = arith.constant 0 : i32
    return %c0_i32, %c0_i32_0 : i32, i32
  }
  func.func @transform_6(%arg0: i32) -> (i32, i32) {
    %c0_i32 = arith.constant 0 : i32
    %c0_i32_0 = arith.constant 0 : i32
    %c0_i32_1 = arith.constant 0 : i32
    return %c0_i32, %c0_i32_0 : i32, i32
  }
  func.func @transform_7(%arg0: i32) -> (i32, i32) {
    %c0_i32 = arith.constant 0 : i32
    %c0_i32_0 = arith.constant 0 : i32
    %c0_i32_1 = arith.constant 0 : i32
    return %c0_i32, %c0_i32_0 : i32, i32
  }
  func.func @transform_8(%arg0: i32) -> (i32, i32) {
    %c0_i32 = arith.constant 0 : i32
    %c0_i32_0 = arith.constant 0 : i32
    %c0_i32_1 = arith.constant 0 : i32
    return %c0_i32, %c0_i32_0 : i32, i32
  }
  func.func @transform_9(%arg0: i32) -> (i32, i32) {
    %c0_i32 = arith.constant 0 : i32
    %c0_i32_0 = arith.constant 0 : i32
    %c0_i32_1 = arith.constant 0 : i32
    return %c0_i32, %c0_i32_0 : i32, i32
  }
  func.func @transform_10(%arg0: i32) -> (i32, i32) {
    %c0_i32 = arith.constant 0 : i32
    %c0_i32_0 = arith.constant 0 : i32
    %c0_i32_1 = arith.constant 0 : i32
    return %c0_i32, %c0_i32_0 : i32, i32
  }
  func.func @transform_11(%arg0: i32) -> (i32, i32) {
    %c0_i32 = arith.constant 0 : i32
    %c0_i32_0 = arith.constant 0 : i32
    %c0_i32_1 = arith.constant 0 : i32
    return %c0_i32, %c0_i32_0 : i32, i32
  }
  func.func @transform_12(%arg0: i32) -> (i32, i32) {
    %c0_i32 = arith.constant 0 : i32
    %c0_i32_0 = arith.constant 0 : i32
    %c0_i32_1 = arith.constant 0 : i32
    return %c0_i32, %c0_i32_0 : i32, i32
  }
  func.func @transform_13(%arg0: i32) -> (i32, i32) {
    %c0_i32 = arith.constant 0 : i32
    %c0_i32_0 = arith.constant 0 : i32
    %c0_i32_1 = arith.constant 0 : i32
    return %c0_i32, %c0_i32_0 : i32, i32
  }
  func.func @transform_14(%arg0: i32) -> (i32, i32) {
    %c0_i32 = arith.constant 0 : i32
    %c0_i32_0 = arith.constant 0 : i32
    %c0_i32_1 = arith.constant 0 : i32
    return %c0_i32, %c0_i32_0 : i32, i32
  }
  func.func @transform_15(%arg0: i32) -> (i32, i32) {
    %c0_i32 = arith.constant 0 : i32
    %c0_i32_0 = arith.constant 0 : i32
    return %arg0, %c0_i32 : i32, i32
  }
}

</mosaic_0001>

<bundles_post_ra>
// kernel: tpu_custom_call.1
= control target key start
LH: loop header
LB: loop body
LE: loop exit
PB: predicated region body
PF: predicated region fallthrough
CT: control target
= control target key end

     0   :  { %s5521_s0 = inlined_call_operand.hbm [shape: bf16[200,768], index: 0, kind: input, shape index: {}]   ;;  %s5522_s1 = inlined_call_operand.hbm [shape: bf16[768,128], index: 1, kind: input, shape index: {}]   ;;  %s5523_s2 = inlined_call_operand.vmem [shape: bf16[1,128], index: 2, kind: input, shape index: {}]   ;;  %s5524_s3 = inlined_call_operand.vmem [shape: bf16[128,64], index: 3, kind: input, shape index: {}]   ;;  %s5525_s4 = inlined_call_operand.vmem [shape: bf16[1,64], index: 4, kind: input, shape index: {}]   ;;  %s5526_s5 = inlined_call_operand.vmem [shape: bf16[64,12], index: 5, kind: input, shape index: {}]   ;;  %s5527_s6 = inlined_call_operand.vmem [shape: bf16[1,12], index: 6, kind: input, shape index: {}]   ;;  %s5528_s7 = inlined_call_operand.vmem [shape: bf16[12,12], index: 7, kind: input, shape index: {}]   ;;  %s5529_s8 = inlined_call_operand.vmem [shape: bf16[1,12], index: 8, kind: input, shape index: {}]   ;;  %s5530_s9 = inlined_call_operand.vmem [shape: bf16[12,64], index: 9, kind: input, shape index: {}]   ;;  %s5531_s10 = inlined_call_operand.vmem [shape: bf16[1,64], index: 10, kind: input, shape index: {}]   ;;  %s5532_s11 = inlined_call_operand.vmem [shape: bf16[64,128], index: 11, kind: input, shape index: {}]   ;;  %s5533_s12 = inlined_call_operand.vmem [shape: bf16[1,128], index: 12, kind: input, shape index: {}]   ;;  %s5534_s13 = inlined_call_operand.hbm [shape: bf16[128,768], index: 13, kind: input, shape index: {}]   ;;  %s5535_s14 = inlined_call_operand.vmem [shape: bf16[1,768], index: 14, kind: input, shape index: {}]   ;;  %s5536_s15 = inlined_call_operand.hbm [shape: bf16[200,768], index: 15, kind: output, shape index: {}]  }
   0x1   :  { %5545 = sst [smem:[#allocation17_spill]] %s5531_s10 }
   0x2   :  { %5546 = sst [smem:[#allocation18_spill]] %s5533_s12 }
   0x3   :  { %5547 = sst [smem:[#allocation19_spill]] %s5535_s14 }
   0x4   :  { %5548 = sst [smem:[#allocation20_spill]] %s5536_s15 }
   0x5   :  { %20 = vsyncpa [#allocation3], 0 }
   0x6   :  { %22 = vsyncpa [#allocation3 + $0x1], 0 }
   0x7   :  { %23 = vsyncpa [#allocation6], 0 }
   0x8   :  { %24 = vsyncpa [#allocation4], 0 }
   0x9   :  { %26 = vsyncpa [#allocation4 + $0x1], 0  ;;  %s4773_s18 = smov 0   ;;  %s4775_s19 = smov 0  }
   0xa   :  { %s4777_s20 = smov 0   ;;  %s4779_s21 = smov 0  }
   0xb LB: > { %5549 = sst [smem:[#allocation12_spill]] %s4663_s18  ;;  %s4794_s22 = sadd.s32 4294967295, %s4675_s21   ;;  %s4675_s21 = sphi %s4779_s21, %s5572_s21   ;;  %s4671_s20 = sphi %s4777_s20, %s5576_s20   ;;  %s4667_s19 = sphi %s4775_s19, %s5575_s19   ;;  %s4663_s18 = sphi %s4773_s18, %s5574_s18  }
   0xc   : > { %s3500_s23 = sadd.s32 4294967294, %s4675_s21   ;;  %s4798_s24 = sadd.s32 1, %s4675_s21  }
   0xd   : > { %5550 = sst [smem:[#allocation13_spill]] %s4798_s24  ;;  %s39_s25 = sadd.s32 1, %s4671_s20 }
   0xe   : > { %s36_s26 = ssub.s32 %s4675_s21, %s4798_s24  ;;  %p46_p0 = scmp.ne.s32.totalorder %s4671_s20, %s4667_s19 }
   0xf   : > { %p37_p1 = scmp.eq.s32.totalorder %s36_s26, 0  ;;  %p47_p2 = scmp.eq.s32.totalorder %s4675_s21, 0 }
  0x10   : > { %p52_p3 = scmp.ne.s32.totalorder %s4667_s19, %s4663_s18  ;;  %p5543_p4 = scmp.eq.s32.totalorder %s4794_s22, 0 }
  0x11   : > { %s4810_s27 = scalar_select %p37_p1, %s4671_s20, %s39_s25  }
  0x12   : > { %p4812_p5 = por %p47_p2, %p46_p0  ;;  %p4818_p6 = por %p5543_p4, %p52_p3 }
  0x13   : > { %5551 = sst [smem:[#allocation14_spill]] %s4810_s27  ;;  %p370_p7 = scmp.eq.s32.totalorder %s4794_s22, 1 }
  0x14   : > { %s5553_s29 = scalar_select %p4818_p6, 1, 0 }
  0x15   : > { %p376_p8 = scmp.eq.s32.totalorder %s3500_s23, 1  ;;  %p3501_p9 = scmp.ge.s32.totalorder %s4675_s21, 1 }
  0x16   : > { %p383_p10 = scmp.lt.s32.totalorder %s4675_s21, 3  ;;  %p4825_p11 = por %p370_p7, %p46_p0 }
  0x17   : > { %p4829_p12 = por %p376_p8, %p52_p3  ;;  %s4677_s25 = smov [#allocation5]  }
  0x18   : > { %s5554_s30 = scalar_select %p4825_p11, 1, 0 }
  0x19   : > { %s5556_s16 = scalar_select %p4829_p12, 1, 0 }
  0x1a   : > { %5555 = sst [smem:[#allocation15_spill]] %s5554_s30  ;;  %p4833_p13 = pnand %p3501_p9, %p383_p10 }
  0x1b   : > { %5557 = sst [smem:[#allocation16_spill]] %s5556_s16  ;;  %s395_s26 = sshll.u32 %s4677_s25, 4  ;;  %s396_s26 = int_to_ptr.vmem [resolvable:$true] %s395_s26 }
  0x1c   : > { %p4179_p1 = pneg %p4833_p13  ;;  %s4678_s27 = smov [#allocation7]  }
  0x1d   : > { %s441_s24 = sshll.u32 %s4678_s27, 4  ;;  %s4540_s16 = scalar_lea.vmem %s396_s26, 6144  ;;  %s442_s24 = int_to_ptr.vmem [resolvable:$true] %s441_s24 }
  0x1e   : > { %p4841_p2 = pnand %p4179_p1, %p5543_p4  ;;  %p4541_p3 = scmp.ne.s32.totalorder %s396_s26, %s4540_s16 }
  0x1f   : > { %p4548_p9 = scmp.lt.s32.totalorder %s396_s26, %s396_s26  ;;  %p4549_p10 = scmp.lt.s32.totalorder %s4540_s16, %s4540_s16 }
  0x20   : > { %p4531_p0 = pneg %p4841_p2 }
  0x21   : > { %p4550_p12 = por %p4549_p10, %p4548_p9 }
  0x22   : > { %p4543_p7 = pnand %p4541_p3, %p4531_p0 }
  0x24   : > { %p4544_p8 = pneg %p4543_p7 }
  0x26   : > { %p4551_p1 = pnand %p4550_p12, %p4544_p8 }
  0x28   : > { %4554 = shalt.err (!%p4551_p1)
}
  0x29   : > { %s4679_s25 = smov 64   ;;  %s4680_s18 = smov 4  }
  0x2a   : > { %4182 = dma.hbm_to_vmem [thread:$0]  (!%p4841_p2), %s5522_s1, 6144, %s396_s26, [#allocation6], %s4679_s25, %s4679_s25, %s4680_s18  }
  0x2b   : > { %s4566_s30 = scalar_lea.vmem %s442_s24, 6144  ;;  %p4574_p11 = scmp.lt.s32.totalorder %s442_s24, %s442_s24 }
  0x2c   : > { %p4567_p4 = scmp.ne.s32.totalorder %s442_s24, %s4566_s30  ;;  %p4575_p6 = scmp.lt.s32.totalorder %s4566_s30, %s4566_s30 }
  0x2e   : > { %p4569_p3 = pnand %p4567_p4, %p4531_p0  ;;  %p4576_p9 = por %p4575_p6, %p4574_p11 }
  0x30   : > { %p4570_p7 = pneg %p4569_p3 }
  0x32   : > { %p4577_p12 = pnand %p4576_p9, %p4570_p7 }
  0x34   : > { %4580 = shalt.err (!%p4577_p12)
}
  0x35   : > { %s4681_s16 = smov 384   ;;  %s4682_s14 = smov 24  }
  0x36   : > { %4185 = dma.hbm_to_vmem [thread:$0]  (!%p4841_p2), %s5534_s13, 6144, %s442_s24, [#allocation6], %s4681_s16, %s4681_s16, %s4682_s14  }
  0x37   : > { %p3504_p8 = scmp.ge.s32.totalorder %s4675_s21, 2 }
  0x39   : > { %454 = sbr.rel (%p3504_p8) target bundleno = 97 (0x61), region = 72 }
  0x3e   : > { %457 = sbr.rel (!%p4812_p5) target bundleno = 97 (0x61), region = 76  ;;  %s458_s15 = sand.u32 (%p4812_p5), 1, %s4671_s20  }
  0x3f   : > { %s463_s18 = smul.u32 (%p4812_p5), 14, %s4675_s21  ;;  %s4873_s12 = scalar_lea.sflag (%p4812_p5), [#allocation3], %s458_s15 }
  0x40   : > { %s4165_s30 = smul.u32 (%p4812_p5), 336, %s458_s15 }
  0x41   : > { %s464_s26 = ssub.s32 (%p4812_p5), 25, %s463_s18 }
  0x42   : > { %p465_p4 = scmp.lt.s32.totalorder (%p4812_p5), %s464_s26, 14  ;;  %s462_s14 = scalar_lea.vmem (%p4812_p5), [#allocation2], %s4165_s30 }
  0x44   : > { %s5578_s26 = smov (!%p465_p4, %s464_s26), 14 }
  0x45   : > { %s4870_s23 = smul.u32 384, %s5578_s26 }
  0x47   : > { %s470_s10 = ssub.s32 5376, %s4870_s23 }
  0x48   : > { %471 = vsyncadd %s4873_s12, %s470_s10  ;;  %p3507_p5 = scmp.ne.s32.totalorder %s4870_s23, 0  ;;  %s4192_s24 = smul.u32 5376, %s4675_s21 }
  0x49   : > { %s477_s28 = sshll.u32 %s462_s14, 4  ;;  %s4585_s26 = scalar_lea.hbm %s5521_s0, 9600  ;;  %s4883_s28 = int_to_ptr.vmem [resolvable:$true] %s477_s28 }
  0x4a   : > { %s4881_s16 = scalar_lea.hbm %s5521_s0, %s4192_s24 }
  0x4b   : > { %s4581_s15 = scalar_lea.hbm %s4881_s16, %s4870_s23  ;;  %p4586_p0 = scmp.lt.s32.totalorder %s4881_s16, %s5521_s0 }
  0x4c   : > { %p4582_p6 = scmp.ne.s32.totalorder %s4881_s16, %s4581_s15  ;;  %p4587_p10 = scmp.lt.s32.totalorder %s4585_s26, %s4581_s15 }
  0x4e   : > { %p4583_p11 = pnand %p4582_p6, %p3507_p5  ;;  %p4588_p1 = por %p4587_p10, %p4586_p0 }
  0x50   : > { %p4584_p2 = pneg %p4583_p11 }
  0x52   : > { %p4589_p3 = pnand %p4588_p1, %p4584_p2 }
  0x54   : > { %4592 = shalt.err (!%p4589_p3)
}
  0x55   : > { %s4593_s24 = scalar_lea.vmem %s4883_s28, %s4870_s23  ;;  %s4683_s25 = smov [#allocation2]  }
  0x56   : > { %p4594_p7 = scmp.ne.s32.totalorder %s4883_s28, %s4593_s24  ;;  %s4597_s27 = sshll.u32 %s4683_s25, 4  ;;  %s4598_s27 = int_to_ptr.vmem [resolvable:$false] %s4597_s27 }
  0x57   : > { %s4599_s18 = scalar_lea.vmem %s4598_s27, 10752  ;;  %p4600_p4 = scmp.lt.s32.totalorder %s4883_s28, %s4598_s27 }
  0x58   : > { %p4595_p9 = pnand %p4594_p7, %p3507_p5  ;;  %p4601_p6 = scmp.lt.s32.totalorder %s4599_s18, %s4593_s24 }
  0x5a   : > { %p4596_p12 = pneg %p4595_p9  ;;  %p4602_p11 = por %p4601_p6, %p4600_p4 }
  0x5c   : > { %p4603_p0 = pnand %p4602_p11, %p4596_p12 }
  0x5e   : > { %4606 = shalt.err (!%p4603_p0)
}
  0x5f   : > { %s4684_s15 = smov 384   ;;  %s4685_s30 = smov 24  }
  0x60   : > { %483 = dma.hbm_to_vmem [thread:$0]  (%p3507_p5), %s4881_s16, %s4870_s23, %s4883_s28, %s4873_s12, %s4684_s15, %s4684_s15, %s4685_s30  }
  0x61 PF: > { %489 = sbr.rel (%p4833_p13) target bundleno = 1751 (0x6d7), region = 80  ;;  %s4912_s26 = sand.u32 (!%p4833_p13), 1, %s4667_s19  }
  0x62   : > { %s4167_s10 = smul.u32 (!%p4833_p13), 336, %s4912_s26  ;;  %s492_s14 = scalar_lea.sflag (!%p4833_p13), [#allocation3], %s4912_s26 }
  0x63   : > { %p5560_p2 = scmp.ne.s32.totalorder (!%p4833_p13), %s5553_s29, 0 }
  0x64   : > { %s4918_s24 = scalar_lea.vmem (!%p4833_p13), [#allocation2], %s4167_s10 }
  0x66   : > { %4650 = dma.done.wait (%p5560_p2), %s492_s14, 5376  }
  0x67   : > { %4652 = vsyncadd (%p5560_p2), %s492_s14, 4294961920  ;;  %p5561_p5 = scmp.eq.s32.totalorder %s4794_s22, 0 }
  0x69   : > { %4654 = dma.done.wait (%p5561_p5), [#allocation6], 12288   ;;  %p5562_p13 = pmov %p5561_p5 }
  0x6a   : > { %v4243_v0 = vld [vmem:[#allocation5 + $0x78] sm:$0xff]   ;;  %v4245_v2 = vld [vmem:[#allocation5 + $0x70] sm:$0xff]   ;;  %v4247_v4 = vld [vmem:[#allocation5 + $0x68] sm:$0xff]   ;;  %vm4687_vm0 = vmmov 0   ;;  %vm1879_vm1 = vcmask 1045504   ;;  %vm1710_vm2 = vcmask 523264  }
  0x6b   : > { %4656 = vsyncadd (%p5562_p13), [#allocation6], 4294955008  ;;  %v4244_v1 = vld [vmem:[#allocation5 + $0x38] sm:$0xff]   ;;  %3746 = vmatprep.subr.bf16.mxu0 %v4243_v0  ;;  %4149 = vmatprep.subr.bf16.mxu1 %v4243_v0  ;;  %v4246_v3 = vld [vmem:[#allocation5 + $0x30] sm:$0xff]   ;;  %vm1857_vm3 = vcmask 97280   ;;  %s5563_s27 = sld [smem:[#allocation17_spill]] }
  0x6c   : > { %3747 = vmatpush3.bf16.msra.mxu0 %v4244_v1  ;;  %4157 = vmatpush3.bf16.msra.mxu1 %v4244_v1  ;;  %v4248_v5 = vld [vmem:[#allocation5 + $0x28] sm:$0xff]   ;;  %v4249_v6 = vld [vmem:[#allocation5 + $0x60] sm:$0xff]   ;;  %v4251_v8 = vld [vmem:[#allocation5 + $0x58] sm:$0xff]   ;;  %s5564_s30 = sld [smem:[#allocation18_spill]]  ;;  %s5374_s17 = scalar_lea.vmem [#allocation8], %s4167_s10 }
  0x6d   : > { %3748 = vmatprep.subr.bf16.mxu0 %v4245_v2  ;;  %4150 = vmatprep.subr.bf16.mxu1 %v4245_v2  ;;  %v4250_v7 = vld [vmem:[#allocation5 + $0x20] sm:$0xff]   ;;  %v4252_v9 = vld [vmem:[#allocation5 + $0x18] sm:$0xff]   ;;  %v4253_v10 = vld [vmem:[#allocation5 + $0x50] sm:$0xff]   ;;  %s5565_s29 = sld [smem:[#allocation19_spill]]  ;;  %s3387_s10 = scalar_lea.sflag [#allocation4], %s4912_s26 }
  0x6e   : > { %v4261_v11 = vld [vmem:[%s4918_s24 + $0x4] ss:$24 sps:$4 sm:$0xff]   ;;  %v4259_v19 = vld [vmem:[%s4918_s24] ss:$24 sps:$4 sm:$0xff]   ;;  %v4273_v26 = vld [vmem:[%s4918_s24 + $0x34] ss:$24 sps:$4 sm:$0xff]  }
  0x6f   : > { %v4264_v12 = vld [vmem:[%s4918_s24 + $0xc4] ss:$24 sps:$4 sm:$0xff]   ;;  %1232 = vmatprep.mubr.bf16.mxu0 %v4261_v11  ;;  %v4262_v20 = vld [vmem:[%s4918_s24 + $0xc0] ss:$24 sps:$4 sm:$0xff]   ;;  %v4278_v28 = vld [vmem:[%s4918_s24 + $0xf4] ss:$24 sps:$4 sm:$0xff]  }
  0x70   : > { %3749 = vmatpush3.bf16.msra.mxu0 %v4246_v3  ;;  %4158 = vmatpush3.bf16.msra.mxu1 %v4246_v3  ;;  %v4254_v13 = vld [vmem:[#allocation5 + $0x10] sm:$0xff]   ;;  %v4255_v14 = vld [vmem:[#allocation5 + $0x48] sm:$0xff]   ;;  %v4257_v16 = vld [vmem:[#allocation5 + $0x40] sm:$0xff]   ;;  %s5566_s23 = sld [smem:[#allocation15_spill]] }
  0x71   : > { %3750 = vmatprep.subr.bf16.mxu0 %v4247_v4  ;;  %4151 = vmatprep.subr.bf16.mxu1 %v4247_v4  ;;  %v4256_v15 = vld [vmem:[#allocation5 + $0x8] sm:$0xff]   ;;  %v4258_v17 = vld [vmem:[#allocation5] sm:$0xff]   ;;  %v4265_v18 = vld [vmem:[#allocation5 + $0xf8] sm:$0xff]   ;;  %v4686_v4 = vmov 0.0  }
  0x72   : > { %1264 = vmatprep.mubr.bf16.mxu1 %v4264_v12  ;;  %v4266_v21 = vld [vmem:[#allocation5 + $0x178] sm:$0xff]   ;;  %v4269_v24 = vld [vmem:[#allocation5 + $0xf0] sm:$0xff]   ;;  %v4276_v30 = vld [vmem:[#allocation5 + $0xe8] sm:$0xff]  }
  0x73   : > { %v4267_v22 = vld [vmem:[#allocation5 + $0xb8] sm:$0xff]   ;;  %v4270_v25 = vld [vmem:[#allocation5 + $0x170] sm:$0xff]   ;;  %v4277_v32 = vld [vmem:[#allocation5 + $0x168] sm:$0xff]  }
  0x74   : > { %3751 = vmatpush3.bf16.msra.mxu0 %v4248_v5  ;;  %4159 = vmatpush3.bf16.msra.mxu1 %v4248_v5  ;;  %v4268_v23 = vld [vmem:[#allocation5 + $0x138] sm:$0xff]   ;;  %v4271_v27 = vld [vmem:[#allocation5 + $0xb0] sm:$0xff]   ;;  %v4280_v33 = vld [vmem:[#allocation5 + $0xa8] sm:$0xff]  }
  0x75   : > { %3752 = vmatprep.subr.bf16.mxu0 %v4249_v6  ;;  %4152 = vmatprep.subr.bf16.mxu1 %v4249_v6  ;;  %v4272_v29 = vld [vmem:[#allocation5 + $0x130] sm:$0xff]   ;;  %v4281_v34 = vld [vmem:[#allocation5 + $0x128] sm:$0xff]   ;;  %v4283_v36 = vld [vmem:[#allocation5 + $0xe0] sm:$0xff]  }
  0x76   : > { %v4275_v31 = vld [vmem:[%s4918_s24 + $0x30] ss:$24 sps:$4 sm:$0xff]   ;;  %v4287_v38 = vld [vmem:[%s4918_s24 + $0x64] ss:$24 sps:$4 sm:$0xff]   ;;  %v4289_v43 = vld [vmem:[%s4918_s24 + $0x60] ss:$24 sps:$4 sm:$0xff]  }
  0x77   : > { %v4282_v35 = vld [vmem:[%s4918_s24 + $0xf0] ss:$24 sps:$4 sm:$0xff]   ;;  %v4292_v39 = vld [vmem:[%s4918_s24 + $0x124] ss:$24 sps:$4 sm:$0xff]   ;;  %v4296_v47 = vld [vmem:[%s4918_s24 + $0x120] ss:$24 sps:$4 sm:$0xff]  }
  0x78   : > { %3753 = vmatpush3.bf16.msra.mxu0 %v4250_v7  ;;  %4160 = vmatpush3.bf16.msra.mxu1 %v4250_v7  ;;  %v4284_v37 = vld [vmem:[#allocation5 + $0x160] sm:$0xff]   ;;  %v4290_v42 = vld [vmem:[#allocation5 + $0xd8] sm:$0xff]   ;;  %v4297_v48 = vld [vmem:[#allocation5 + $0xd0] sm:$0xff]   ;;  %p5567_p10 = scmp.ne.s32.totalorder %s5566_s23, 0 }
  0x79   : > { %3754 = vmatprep.subr.bf16.mxu0 %v4251_v8  ;;  %4153 = vmatprep.subr.bf16.mxu1 %v4251_v8  ;;  %v4285_v40 = vld [vmem:[#allocation5 + $0xa0] sm:$0xff]   ;;  %v4291_v44 = vld [vmem:[#allocation5 + $0x158] sm:$0xff]   ;;  %v4298_v49 = vld [vmem:[#allocation5 + $0x150] sm:$0xff]   ;;  %s3394_s12 = smul.u32 (%p5567_p10), 14, %s4794_s22 }
  0x7a   : > { %v4286_v41 = vld [vmem:[#allocation5 + $0x120] sm:$0xff]   ;;  %v4294_v45 = vld [vmem:[#allocation5 + $0x98] sm:$0xff]   ;;  %v4299_v50 = vld [vmem:[#allocation5 + $0x90] sm:$0xff]  }
  0x7b   : > { %v4295_v46 = vld [vmem:[#allocation5 + $0x118] sm:$0xff]   ;;  %v4300_v52 = vld [vmem:[#allocation5 + $0x110] sm:$0xff]   ;;  %v4304_v53 = vld [vmem:[#allocation5 + $0xc8] sm:$0xff]   ;;  %s3395_s28 = ssub.s32 (%p5567_p10), 25, %s3394_s12 }
  0x7c   : > { %3755 = vmatpush3.bf16.msra.mxu0 %v4252_v9  ;;  %4161 = vmatpush3.bf16.msra.mxu1 %v4252_v9  ;;  %v4301_v51 = vld [vmem:[%s4918_s24 + $0x94] ss:$24 sps:$4 sm:$0xff]   ;;  %v4303_v54 = vld [vmem:[%s4918_s24 + $0x90] ss:$24 sps:$4 sm:$0xff]   ;;  %v4320_v3 = vld [vmem:[%s4918_s24 + $0x44] ss:$24 sps:$4 sm:$0xff]  }
  0x7d   : > { %3756 = vmatprep.subr.bf16.mxu0 %v4253_v10  ;;  %4154 = vmatprep.subr.bf16.mxu1 %v4253_v10  ;;  %v4305_v55 = vld [vmem:[#allocation5 + $0x148] sm:$0xff]   ;;  %v4308_v58 = vld [vmem:[#allocation5 + $0xc0] sm:$0xff]   ;;  %v4354_v11 = vld [vmem:[%s5524_s3 + $0x38] sm:$0xff]   ;;  %p3396_p1 = scmp.lt.s32.totalorder (%p5567_p10), %s3395_s28, 14 }
  0x7e   : > { %v4306_v56 = vld [vmem:[#allocation5 + $0x88] sm:$0xff]   ;;  %v4309_v59 = vld [vmem:[#allocation5 + $0x140] sm:$0xff]  }
  0x7f   : > { %v4307_v57 = vld [vmem:[#allocation5 + $0x108] sm:$0xff]   ;;  %v4310_v60 = vld [vmem:[#allocation5 + $0x80] sm:$0xff]  }
  0x80   : > { %3757 = vmatpush3.bf16.msra.mxu0 %v4254_v13  ;;  %4162 = vmatpush3.bf16.msra.mxu1 %v4254_v13  ;;  %v4314_v61 = vld [vmem:[%s4918_s24 + $0xc] ss:$24 sps:$4 sm:$0xff]   ;;  %v4312_v0 = vld [vmem:[%s4918_s24 + $0x8] ss:$24 sps:$4 sm:$0xff]   ;;  %v4318_v2 = vld [vmem:[%s4918_s24 + $0x3c] ss:$24 sps:$4 sm:$0xff]  }
  0x81   : > { %3758 = vmatprep.subr.bf16.mxu0 %v4255_v14  ;;  %4155 = vmatprep.subr.bf16.mxu1 %v4255_v14  ;;  %v4311_v62 = vld [vmem:[#allocation5 + $0x100] sm:$0xff]  }
  0x82   : > { %v4317_v63 = vld [vmem:[%s4918_s24 + $0x14] ss:$24 sps:$4 sm:$0xff]   ;;  %v4315_v1 = vld [vmem:[%s4918_s24 + $0x10] ss:$24 sps:$4 sm:$0xff]   ;;  %v4323_v6 = vld [vmem:[%s4918_s24 + $0x40] ss:$24 sps:$4 sm:$0xff]  }
  0x83   : > { %v4322_v5 = vld [vmem:[%s4918_s24 + $0x38] ss:$24 sps:$4 sm:$0xff]   ;;  %v4324_v7 = vld [vmem:[%s4918_s24 + $0x6c] ss:$24 sps:$4 sm:$0xff]   ;;  %v4328_v9 = vld [vmem:[%s4918_s24 + $0x68] ss:$24 sps:$4 sm:$0xff]  }
  0x84   : > { %3759 = vmatpush3.bf16.msra.mxu0 %v4256_v15  ;;  %4163 = vmatpush3.bf16.msra.mxu1 %v4256_v15  ;;  %v4326_v8 = vld [vmem:[%s4918_s24 + $0x74] ss:$24 sps:$4 sm:$0xff]   ;;  %v4329_v10 = vld [vmem:[%s4918_s24 + $0x70] ss:$24 sps:$4 sm:$0xff]   ;;  %v4332_v13 = vld [vmem:[%s4918_s24 + $0xa4] ss:$24 sps:$4 sm:$0xff]  }
  0x85   : > { %3760 = vmatprep.subr.bf16.mxu0 %v4257_v16  ;;  %4156 = vmatprep.subr.bf16.mxu1 %v4257_v16  ;;  %v4330_v12 = vld [vmem:[%s4918_s24 + $0x9c] ss:$24 sps:$4 sm:$0xff]   ;;  %v4334_v14 = vld [vmem:[%s4918_s24 + $0x98] ss:$24 sps:$4 sm:$0xff]   ;;  %v4336_v16 = vld [vmem:[%s4918_s24 + $0xcc] ss:$24 sps:$4 sm:$0xff]  }
  0x86   : > { %v4335_v15 = vld [vmem:[%s4918_s24 + $0xa0] ss:$24 sps:$4 sm:$0xff]  }
  0x88   : > { %3761 = vmatpush3.bf16.msra.mxu0 %v4258_v17  ;;  %4164 = vmatpush3.bf16.msra.mxu1 %v4258_v17  ;;  %v4338_v17 = vld [vmem:[%s4918_s24 + $0xd4] ss:$24 sps:$4 sm:$0xff]  }
  0x89   : > { %3804 = vmatprep.subr.bf16.mxu1 %v4265_v18  ;;  %3862 = vmatprep.subr.bf16.mxu0 %v4266_v21  ;;  %v4340_v18 = vld [vmem:[%s4918_s24 + $0xc8] ss:$24 sps:$4 sm:$0xff]   ;;  %v4344_v21 = vld [vmem:[%s4918_s24 + $0x104] ss:$24 sps:$4 sm:$0xff]  }
  0x8b   : > { %1233 = vmatmul.mubr.bf16.vlgmr.msra.gmra.mxu0 %v4259_v19  ;;  %1265 = vmatmul.mubr.bf16.vlgmr.msra.gmra.mxu1 %v4262_v20  ;;  %v4341_v19 = vld [vmem:[%s4918_s24 + $0xd0] ss:$24 sps:$4 sm:$0xff]   ;;  %v4342_v20 = vld [vmem:[%s4918_s24 + $0xfc] ss:$24 sps:$4 sm:$0xff]  }
  0x8c   : > { %3805 = vmatpush3.bf16.msra.mxu1 %v4267_v22  ;;  %3863 = vmatpush3.bf16.msra.mxu0 %v4268_v23  ;;  %v4346_v22 = vld [vmem:[%s4918_s24 + $0xf8] ss:$24 sps:$4 sm:$0xff]  }
  0x8d   : > { %3806 = vmatprep.subr.bf16.mxu1 %v4269_v24  ;;  %3864 = vmatprep.subr.bf16.mxu0 %v4270_v25  ;;  %v4347_v23 = vld [vmem:[%s4918_s24 + $0x100] ss:$24 sps:$4 sm:$0xff]   ;;  %v4348_v24 = vld [vmem:[%s4918_s24 + $0x12c] ss:$24 sps:$4 sm:$0xff]  }
  0x8e   : > { %1240 = vmatprep.mubr.bf16.mxu0 %v4273_v26  ;;  %1272 = vmatprep.mubr.bf16.mxu1 %v4278_v28  ;;  %v4350_v25 = vld [vmem:[%s4918_s24 + $0x134] ss:$24 sps:$4 sm:$0xff]   ;;  %v4352_v28 = vld [vmem:[%s4918_s24 + $0x128] ss:$24 sps:$4 sm:$0xff]  }
  0x8f   : > { %v4355_v26 = vld [vmem:[%s5524_s3 + $0x30] sm:$0xff]  }
  0x90   : > { %3807 = vmatpush3.bf16.msra.mxu1 %v4271_v27  ;;  %3865 = vmatpush3.bf16.msra.mxu0 %v4272_v29  ;;  %v4356_v27 = vld [vmem:[%s5524_s3 + $0x28] sm:$0xff]  }
  0x91   : > { %3808 = vmatprep.subr.bf16.mxu1 %v4276_v30  ;;  %3866 = vmatprep.subr.bf16.mxu0 %v4277_v32  ;;  %v4353_v29 = vld [vmem:[%s4918_s24 + $0x130] ss:$24 sps:$4 sm:$0xff]  }
  0x92   : > { %v4357_v30 = vld [vmem:[%s5524_s3 + $0x20] sm:$0xff]   ;;  %v4359_v32 = vld [vmem:[%s5524_s3 + $0x10] sm:$0xff]  }
  0x93   : > { %1241 = vmatmul.mubr.bf16.gmra.mxu0 %v4275_v31  ;;  %1273 = vmatmul.mubr.bf16.gmra.mxu1 %v4282_v35  ;;  %v4358_v31 = vld [vmem:[%s5524_s3 + $0x18] sm:$0xff]  }
  0x94   : > { %3809 = vmatpush3.bf16.msra.mxu1 %v4280_v33  ;;  %3867 = vmatpush3.bf16.msra.mxu0 %v4281_v34  ;;  %v4360_v33 = vld [vmem:[%s5524_s3 + $0x8] sm:$0xff]   ;;  %v4361_v34 = vld [vmem:[%s5524_s3] sm:$0xff]   ;;  %v4362_v35 = vld [vmem:[%s5526_s5 + $0x18] sm:$0xff]  }
  0x95   : > { %3810 = vmatprep.subr.bf16.mxu1 %v4283_v36  ;;  %3868 = vmatprep.subr.bf16.mxu0 %v4284_v37  ;;  %v4363_v36 = vld [vmem:[%s5526_s5 + $0x10] sm:$0xff]   ;;  %v4364_v37 = vld [vmem:[%s5526_s5 + $0x8] sm:$0xff]  }
  0x96   : > { %1248 = vmatprep.mubr.bf16.mxu0 %v4287_v38  ;;  %1280 = vmatprep.mubr.bf16.mxu1 %v4292_v39  ;;  %v4365_v38 = vld [vmem:[%s5526_s5] sm:$0xff]  }
  0x98   : > { %3811 = vmatpush3.bf16.msra.mxu1 %v4285_v40  ;;  %3869 = vmatpush3.bf16.msra.mxu0 %v4286_v41 }
  0x99   : > { %3812 = vmatprep.subr.bf16.mxu1 %v4290_v42  ;;  %3870 = vmatprep.subr.bf16.mxu0 %v4291_v44 }
  0x9b   : > { %1249 = vmatmul.mubr.bf16.gmra.mxu0 %v4289_v43  ;;  %1281 = vmatmul.mubr.bf16.gmra.mxu1 %v4296_v47 }
  0x9c   : > { %3813 = vmatpush3.bf16.msra.mxu1 %v4294_v45  ;;  %3871 = vmatpush3.bf16.msra.mxu0 %v4295_v46 }
  0x9d   : > { %3814 = vmatprep.subr.bf16.mxu1 %v4297_v48  ;;  %3872 = vmatprep.subr.bf16.mxu0 %v4298_v49 }
  0x9e   : > { %1256 = vmatprep.mubr.bf16.mxu0 %v4301_v51  ;;  %1321 = vmatprep.mubr.bf16.mxu1 %v4314_v61 }
  0xa0   : > { %3815 = vmatpush3.bf16.msra.mxu1 %v4299_v50  ;;  %3873 = vmatpush3.bf16.msra.mxu0 %v4300_v52 }
  0xa1   : > { %3816 = vmatprep.subr.bf16.mxu1 %v4304_v53  ;;  %3874 = vmatprep.subr.bf16.mxu0 %v4305_v55 }
  0xa3   : > { %1257 = vmatmul.mubr.bf16.gmra.mxu0 %v4303_v54 }
  0xa4   : > { %3817 = vmatpush3.bf16.msra.mxu1 %v4306_v56  ;;  %3875 = vmatpush3.bf16.msra.mxu0 %v4307_v57 }
  0xa5   : > { %3818 = vmatprep.subr.bf16.mxu1 %v4308_v58  ;;  %3876 = vmatprep.subr.bf16.mxu0 %v4309_v59 }
  0xa6   : > { %1410 = vmatprep.mubr.bf16.mxu0 %v4317_v63 }
  0xa8   : > { %3819 = vmatpush3.bf16.msra.mxu1 %v4310_v60  ;;  %3877 = vmatpush3.bf16.msra.mxu0 %v4311_v62 }
  0xa9   : > { %3973 = vmatprep.subr.bf16.mxu1 %v4686_v4  ;;  %4017 = vmatprep.subr.bf16.mxu0 %v4686_v4 }
  0xab   : > { %1322 = vmatmul.mubr.bf16.vlgmr.msra.gmra.mxu1 %v4312_v0  ;;  %1411 = vmatmul.mubr.bf16.vlgmr.msra.gmra.mxu0 %v4315_v1 }
  0xac   : > { %1329 = vmatprep.mubr.bf16.mxu1 %v4318_v2  ;;  %1418 = vmatprep.mubr.bf16.mxu0 %v4320_v3  ;;  %v1477_v3 = vlaneseq }
  0xad   : > { %3974 = vmatpush3.bf16.msra.mxu1 %v4354_v11  ;;  %4018 = vmatpush3.bf16.msra.mxu0 %v4362_v35 }
  0xae   : > { %3975 = vmatprep.subr.bf16.mxu1 %v4686_v4  ;;  %4019 = vmatprep.subr.bf16.mxu0 %v4686_v4  ;;  %v5067_v11 = vshrl.u32 %v1477_v3, 7 }
  0xb1   : > { %3976 = vmatpush3.bf16.msra.mxu1 %v4355_v26  ;;  %4020 = vmatpush3.bf16.msra.mxu0 %v4363_v36 }
  0xb2   : > { %3977 = vmatprep.subr.bf16.mxu1 %v4686_v4  ;;  %4021 = vmatprep.subr.bf16.mxu0 %v4686_v4 }
  0xb3   : > { %1330 = vmatmul.mubr.bf16.gmra.mxu1 %v4322_v5  ;;  %1419 = vmatmul.mubr.bf16.gmra.mxu0 %v4323_v6 }
  0xb4   : > { %1337 = vmatprep.mubr.bf16.mxu1 %v4324_v7  ;;  %1426 = vmatprep.mubr.bf16.mxu0 %v4326_v8 }
  0xb5   : > { %3978 = vmatpush3.bf16.msra.mxu1 %v4356_v27  ;;  %4022 = vmatpush3.bf16.msra.mxu0 %v4364_v37 }
  0xb6   : > { %3979 = vmatprep.subr.bf16.mxu1 %v4686_v4  ;;  %4023 = vmatprep.subr.bf16.mxu0 %v4686_v4 }
  0xb9   : > { %3980 = vmatpush3.bf16.msra.mxu1 %v4357_v30  ;;  %4024 = vmatpush3.bf16.msra.mxu0 %v4365_v38 }
  0xba   : > { %3981 = vmatprep.subr.bf16.mxu1 %v4686_v4  ;;  %4083 = vmatprep.subr.bf16.mxu0 %v4686_v4 }
  0xbb   : > { %1338 = vmatmul.mubr.bf16.gmra.mxu1 %v4328_v9  ;;  %1427 = vmatmul.mubr.bf16.gmra.mxu0 %v4329_v10  ;;  %v701_v10 = vld [vmem:[%s5523_s2] sm:$0x1] }
  0xbc   : > { %1345 = vmatprep.mubr.bf16.mxu1 %v4330_v12  ;;  %1434 = vmatprep.mubr.bf16.mxu0 %v4332_v13 }
  0xbd   : > { %3982 = vmatpush3.bf16.msra.mxu1 %v4358_v31 }
  0xbe   : > { %3983 = vmatprep.subr.bf16.mxu1 %v4686_v4 }
  0xc1   : > { %3984 = vmatpush3.bf16.msra.mxu1 %v4359_v32 }
  0xc2   : > { %3985 = vmatprep.subr.bf16.mxu1 %v4686_v4 }
  0xc3   : > { %1346 = vmatmul.mubr.bf16.gmra.mxu1 %v4334_v14  ;;  %1435 = vmatmul.mubr.bf16.gmra.mxu0 %v4335_v15 }
  0xc4   : > { %1353 = vmatprep.mubr.bf16.mxu1 %v4336_v16  ;;  %1442 = vmatprep.mubr.bf16.mxu0 %v4338_v17  ;;  %v1475_v17 = vpack.i.b16 %v701_v10, %v701_v10 }
  0xc5   : > { %3986 = vmatpush3.bf16.msra.mxu1 %v4360_v33 }
  0xc6   : > { %3987 = vmatprep.subr.bf16.mxu1 %v4686_v4 }
  0xc9   : > { %3988 = vmatpush3.bf16.msra.mxu1 %v4361_v34 }
  0xca   : > { %4053 = vmatprep.subr.bf16.mxu1 %v4686_v4 }
  0xcb   : > { %1354 = vmatmul.mubr.bf16.gmra.mxu1 %v4340_v18  ;;  %1443 = vmatmul.mubr.bf16.gmra.mxu0 %v4341_v19 }
  0xcc   : > { %1361 = vmatprep.mubr.bf16.mxu1 %v4342_v20  ;;  %1450 = vmatprep.mubr.bf16.mxu0 %v4344_v21  ;;  %v5070_v21 = vsub.s32 0, %v5067_v11 }
  0xce   : > { %v5073_v31 = vrot.slane %v1475_v17, %v5070_v21 }
  0xd3   : > { %1362 = vmatmul.mubr.bf16.gmra.mxu1 %v4346_v22  ;;  %1451 = vmatmul.mubr.bf16.gmra.mxu0 %v4347_v23 }
  0xd4   : > { %1369 = vmatprep.mubr.bf16.mxu1 %v4348_v24  ;;  %1458 = vmatprep.mubr.bf16.mxu0 %v4350_v25 }
  0xdb   : > { %1370 = vmatmul.mubr.bf16.gmra.mxu1 %v4352_v28  ;;  %1459 = vmatmul.mubr.bf16.gmra.mxu0 %v4353_v29 }
  0xdc   : > { %3989 = vmatprep.mubr.msk.bf16.mxu1 %vm4687_vm0, %v4686_v4  ;;  %4025 = vmatprep.mubr.msk.bf16.mxu0 %vm4687_vm0, %v4686_v4 }
 0x14b   : > { %v3762_v39 = vpop.f32.mrf.mxu0  ;;  %v5024_v40 = vpop.f32.mrf.mxu1 }
 0x14d   : > { %v3763_v41 = vpop.f32.mrf.mxu0  ;;  %v5026_v42 = vpop.f32.mrf.mxu1 }
 0x14e   : > { %v3764_v14 = vadd.f32 %v3763_v41, %v3762_v39 }
 0x14f   : > { %v3765_v43 = vpop.f32.mrf.mxu0  ;;  %v5028_v44 = vpop.f32.mrf.mxu1 }
 0x151   : > { %v3766_v45 = vpop.f32.mrf.mxu0  ;;  %v5030_v46 = vpop.f32.mrf.mxu1 }
 0x152   : > { %v3767_v18 = vadd.f32 %v3766_v45, %v3765_v43 }
 0x153   : > { %v3768_v47 = vpop.f32.mrf.mxu0  ;;  %v5032_v48 = vpop.f32.mrf.mxu1 }
 0x155   : > { %v3769_v49 = vpop.f32.mrf.mxu0  ;;  %v5034_v50 = vpop.f32.mrf.mxu1 }
 0x156   : > { %v3770_v35 = vadd.f32 %v3769_v49, %v3768_v47 }
 0x157   : > { %v3771_v51 = vpop.f32.mrf.mxu0  ;;  %v5036_v52 = vpop.f32.mrf.mxu1 }
 0x159   : > { %v3772_v53 = vpop.f32.mrf.mxu0  ;;  %v5038_v54 = vpop.f32.mrf.mxu1 }
 0x15a   : > { %v3773_v39 = vadd.f32 %v3772_v53, %v3771_v51 }
 0x15b   : > { %v5040_v55 = vpop.f32.mrf.mxu0  ;;  %v5044_v57 = vpop.f32.mrf.mxu1 }
 0x15d   : > { %v5042_v56 = vpop.f32.mrf.mxu0  ;;  %v5048_v59 = vpop.f32.mrf.mxu1 }
 0x15e   : > { %v3776_v53 = vadd.f32 %v5042_v56, %v5040_v55 }
 0x15f   : > { %v5046_v58 = vpop.f32.mrf.mxu0  ;;  %v5054_v62 = vpop.f32.mrf.mxu1 }
 0x161   : > { %v5050_v60 = vpop.f32.mrf.mxu0  ;;  %v5060_v1 = vpop.f32.mrf.mxu1 }
 0x163   : > { %v5052_v61 = vpop.f32.mrf.mxu0 }
 0x165   : > { %v5056_v63 = vpop.f32.mrf.mxu0 }
 0x167   : > { %v5058_v0 = vpop.f32.mrf.mxu0 }
 0x169   : > { %v5062_v2 = vpop.f32.mrf.mxu0 }
 0x16b   : > { %v3820_v5 = vpop.f32.mrf.mxu1  ;;  %v3878_v6 = vpop.f32.mrf.mxu0 }
 0x16d   : > { %v3821_v7 = vpop.f32.mrf.mxu1  ;;  %v3879_v8 = vpop.f32.mrf.mxu0 }
 0x16e   : > { %v3822_v9 = vadd.f32 %v3821_v7, %v3820_v5  ;;  %v3880_v24 = vadd.f32 %v3879_v8, %v3878_v6  ;;  %v4688_v6 = vmov 0  }
 0x16f   : > { %v3823_v12 = vpop.f32.mrf.mxu1  ;;  %v3881_v13 = vpop.f32.mrf.mxu0 }
 0x170   : > { %v1324_v19 = vadd.f32 %v3822_v9, %v3764_v14 }
 0x171   : > { %v3824_v15 = vpop.f32.mrf.mxu1  ;;  %v3882_v16 = vpop.f32.mrf.mxu0 }
 0x172   : > { %v3825_v20 = vadd.f32 %v3824_v15, %v3823_v12  ;;  %v3883_v26 = vadd.f32 %v3882_v16, %v3881_v13  ;;  %v1413_v29 = vadd.f32 %v3880_v24, %v1324_v19  ;;  %v3779_v19 = vadd.f32 %v5050_v60, %v5046_v58 }
 0x173   : > { %v3826_v22 = vpop.f32.mrf.mxu1  ;;  %v3884_v23 = vpop.f32.mrf.mxu0  ;;  %v3782_v58 = vadd.f32 %v5056_v63, %v5052_v61 }
 0x174   : > { %v1327_v25 = vadd.f32 %v3825_v20, %v3767_v18 }
 0x175   : > { %v3827_v27 = vpop.f32.mrf.mxu1  ;;  %v3885_v28 = vpop.f32.mrf.mxu0 }
 0x176   : > { %v1416_v30 = vadd.f32 %v3883_v26, %v1327_v25  ;;  %v3828_v32 = vadd.f32 %v3827_v27, %v3826_v22  ;;  %v3886_v8 = vadd.f32 %v3885_v28, %v3884_v23 }
 0x177   : > { %v3829_v33 = vpop.f32.mrf.mxu1  ;;  %v3887_v34 = vpop.f32.mrf.mxu0 }
 0x178   : > { %v1467_v36 = vpack.c.bf16 %v1416_v30, %v1413_v29  ;;  %v1332_v43 = vadd.f32 %v3828_v32, %v3770_v35 }
 0x179   : > { %v3830_v37 = vpop.f32.mrf.mxu1  ;;  %v3888_v38 = vpop.f32.mrf.mxu0 }
 0x17a   : > { %v1481_v41 = vadd.bf16 %v5073_v31, %v1467_v36  ;;  %v3831_v45 = vadd.f32 %v3830_v37, %v3829_v33  ;;  %v3889_v10 = vadd.f32 %v3888_v38, %v3887_v34  ;;  %v1421_v14 = vadd.f32 %v3886_v8, %v1332_v43 }
 0x17b   : > { %v3832_v3 = vpop.f32.mrf.mxu1  ;;  %v3890_v5 = vpop.f32.mrf.mxu0  ;;  %v3785_v38 = vadd.f32 %v5062_v2, %v5058_v0  ;;  %v3788_v0 = vadd.f32 %v5026_v42, %v5024_v40 }
 0x17c   : > { %v1488_v7 = vmax.bf16 %v4688_v6, %v1481_v41  ;;  %v1335_v9 = vadd.f32 %v3831_v45, %v3773_v39 }
 0x17d   : > { %v3833_v12 = vpop.f32.mrf.mxu1  ;;  %v3891_v13 = vpop.f32.mrf.mxu0 }
 0x17e   : > { %v1424_v47 = vadd.f32 %v3889_v10, %v1335_v9  ;;  %v3834_v49 = vadd.f32 %v3833_v12, %v3832_v3  ;;  %3990 = vmatmul.mubr.bf16.vlgmr.msra.gmra.mxu1 %v1488_v7  ;;  %v3892_v26 = vadd.f32 %v3891_v13, %v3890_v5 }
 0x17f   : > { %v3835_v15 = vpop.f32.mrf.mxu1  ;;  %v3893_v51 = vpop.f32.mrf.mxu0  ;;  %3993 = vmatprep.mubr.msk.bf16.mxu1 %vm4687_vm0, %v4686_v4 }
 0x180   : > { %v1468_v16 = vpack.c.bf16 %v1424_v47, %v1421_v14  ;;  %v1340_v20 = vadd.f32 %v3834_v49, %v3776_v53 }
 0x181   : > { %v3836_v17 = vpop.f32.mrf.mxu1  ;;  %v3894_v18 = vpop.f32.mrf.mxu0 }
 0x182   : > { %v3837_v22 = vadd.f32 %v3836_v17, %v3835_v15  ;;  %v1482_v23 = vadd.bf16 %v5073_v31, %v1468_v16  ;;  %v3895_v28 = vadd.f32 %v3894_v18, %v3893_v51  ;;  %v1429_v55 = vadd.f32 %v3892_v26, %v1340_v20 }
 0x183   : > { %v3838_v24 = vpop.f32.mrf.mxu1  ;;  %v3896_v25 = vpop.f32.mrf.mxu0  ;;  %v3791_v51 = vadd.f32 %v5030_v46, %v5028_v44  ;;  %v3794_v44 = vadd.f32 %v5034_v50, %v5032_v48 }
 0x184   : > { %v1343_v27 = vadd.f32 %v3837_v22, %v3779_v19  ;;  %v1489_v29 = vmax.bf16 %v4688_v6, %v1482_v23 }
 0x185   : > { %v3839_v30 = vpop.f32.mrf.mxu1  ;;  %v3897_v32 = vpop.f32.mrf.mxu0 }
 0x186   : > { %v1432_v56 = vadd.f32 %v3895_v28, %v1343_v27  ;;  %v3840_v33 = vadd.f32 %v3839_v30, %v3838_v24  ;;  %3994 = vmatmul.mubr.bf16.gmra.mxu1 %v1489_v29  ;;  %v3898_v5 = vadd.f32 %v3897_v32, %v3896_v25 }
 0x187   : > { %v3841_v34 = vpop.f32.mrf.mxu1  ;;  %v3899_v35 = vpop.f32.mrf.mxu0  ;;  %3997 = vmatprep.mubr.msk.bf16.mxu1 %vm4687_vm0, %v4686_v4 }
 0x188   : > { %v1469_v60 = vpack.c.bf16 %v1432_v56, %v1429_v55  ;;  %v1348_v39 = vadd.f32 %v3840_v33, %v3782_v58  ;;  %v3797_v55 = vadd.f32 %v5038_v54, %v5036_v52  ;;  %v3800_v52 = vadd.f32 %v5048_v59, %v5044_v57 }
 0x189   : > { %v3842_v36 = vpop.f32.mrf.mxu1  ;;  %v3900_v37 = vpop.f32.mrf.mxu0 }
 0x18a   : > { %v3843_v41 = vadd.f32 %v3842_v36, %v3841_v34  ;;  %v1483_v43 = vadd.bf16 %v5073_v31, %v1469_v60  ;;  %v3901_v8 = vadd.f32 %v3900_v37, %v3899_v35  ;;  %v1437_v61 = vadd.f32 %v3898_v5, %v1348_v39 }
 0x18b   : > { %v3844_v45 = vpop.f32.mrf.mxu1  ;;  %v3902_v3 = vpop.f32.mrf.mxu0 }
 0x18c   : > { %v1351_v7 = vadd.f32 %v3843_v41, %v3785_v38  ;;  %v1490_v9 = vmax.bf16 %v4688_v6, %v1483_v43 }
 0x18d   : > { %v3845_v10 = vpop.f32.mrf.mxu1  ;;  %v3903_v12 = vpop.f32.mrf.mxu0 }
 0x18e   : > { %v1440_v63 = vadd.f32 %v3901_v8, %v1351_v7  ;;  %v3846_v13 = vadd.f32 %v3845_v10, %v3844_v45  ;;  %3998 = vmatmul.mubr.bf16.gmra.mxu1 %v1490_v9  ;;  %v3904_v20 = vadd.f32 %v3903_v12, %v3902_v3  ;;  %v3803_v8 = vadd.f32 %v5060_v1, %v5054_v62  ;;  %v4366_v1 = vld [vmem:[%s5528_s7] sm:$0x3f]  }
 0x18f   : > { %v3847_v14 = vpop.f32.mrf.mxu1  ;;  %v3905_v47 = vpop.f32.mrf.mxu0  ;;  %4001 = vmatprep.mubr.msk.bf16.mxu1 %vm4687_vm0, %v4686_v4 }
 0x190   : > { %v1470_v2 = vpack.c.bf16 %v1440_v63, %v1437_v61  ;;  %v1356_v53 = vadd.f32 %v3846_v13, %v3788_v0 }
 0x191   : > { %v3848_v49 = vpop.f32.mrf.mxu1  ;;  %v3906_v15 = vpop.f32.mrf.mxu0 }
 0x192   : > { %v3849_v16 = vadd.f32 %v3848_v49, %v3847_v14  ;;  %v1484_v17 = vadd.bf16 %v5073_v31, %v1470_v2  ;;  %v3907_v23 = vadd.f32 %v3906_v15, %v3905_v47  ;;  %v1445_v40 = vadd.f32 %v3904_v20, %v1356_v53 }
 0x193   : > { %v3850_v18 = vpop.f32.mrf.mxu1  ;;  %v3908_v19 = vpop.f32.mrf.mxu0  ;;  %v1881_v2 = vsel %vm1879_vm1, %v4366_v1, 0 }
 0x194   : > { %v1359_v22 = vadd.f32 %v3849_v16, %v3791_v51  ;;  %v1491_v24 = vmax.bf16 %v4688_v6, %v1484_v17  ;;  %4054 = vmatpush3.bf16.msra.mxu1 %v1881_v2 }
 0x195   : > { %v3851_v25 = vpop.f32.mrf.mxu1  ;;  %v3909_v26 = vpop.f32.mrf.mxu0  ;;  %4113 = vmatprep.subr.bf16.mxu1 %v4686_v4 }
 0x196   : > { %v1448_v42 = vadd.f32 %v3907_v23, %v1359_v22  ;;  %v3852_v27 = vadd.f32 %v3851_v25, %v3850_v18  ;;  %4002 = vmatmul.mubr.bf16.gmra.mxu1 %v1491_v24  ;;  %v3910_v60 = vadd.f32 %v3909_v26, %v3908_v19 }
 0x197   : > { %v3853_v28 = vpop.f32.mrf.mxu1  ;;  %v3911_v29 = vpop.f32.mrf.mxu0  ;;  %4005 = vmatprep.mubr.msk.bf16.mxu1 %vm4687_vm0, %v4686_v4 }
 0x198   : > { %v1471_v46 = vpack.c.bf16 %v1448_v42, %v1445_v40  ;;  %v1364_v56 = vadd.f32 %v3852_v27, %v3794_v44 }
 0x199   : > { %v3854_v30 = vpop.f32.mrf.mxu1  ;;  %v3912_v32 = vpop.f32.mrf.mxu0 }
 0x19a   : > { %v3855_v33 = vadd.f32 %v3854_v30, %v3853_v28  ;;  %v1485_v34 = vadd.bf16 %v5073_v31, %v1471_v46  ;;  %v3913_v37 = vadd.f32 %v3912_v32, %v3911_v29  ;;  %v1453_v48 = vadd.f32 %v3910_v60, %v1364_v56 }
 0x19b   : > { %v3856_v35 = vpop.f32.mrf.mxu1  ;;  %v3914_v58 = vpop.f32.mrf.mxu0 }
 0x19c   : > { %v1367_v36 = vadd.f32 %v3855_v33, %v3797_v55  ;;  %v1492_v38 = vmax.bf16 %v4688_v6, %v1485_v34 }
 0x19d   : > { %v3857_v39 = vpop.f32.mrf.mxu1  ;;  %v3915_v41 = vpop.f32.mrf.mxu0 }
 0x19e   : > { %v1456_v50 = vadd.f32 %v3913_v37, %v1367_v36  ;;  %v3858_v43 = vadd.f32 %v3857_v39, %v3856_v35  ;;  %4006 = vmatmul.mubr.bf16.gmra.mxu1 %v1492_v38  ;;  %v3916_v61 = vadd.f32 %v3915_v41, %v3914_v58 }
 0x19f   : > { %v3859_v45 = vpop.f32.mrf.mxu1  ;;  %v3917_v3 = vpop.f32.mrf.mxu0  ;;  %4009 = vmatprep.mubr.msk.bf16.mxu1 %vm4687_vm0, %v4686_v4 }
 0x1a0   : > { %v1472_v54 = vpack.c.bf16 %v1456_v50, %v1453_v48  ;;  %v1372_v9 = vadd.f32 %v3858_v43, %v3800_v52 }
 0x1a1   : > { %v3860_v5 = vpop.f32.mrf.mxu1  ;;  %v3918_v7 = vpop.f32.mrf.mxu0 }
 0x1a2   : > { %v3861_v10 = vadd.f32 %v3860_v5, %v3859_v45  ;;  %v1486_v12 = vadd.bf16 %v5073_v31, %v1472_v54  ;;  %v3919_v13 = vadd.f32 %v3918_v7, %v3917_v3  ;;  %v1461_v47 = vadd.f32 %v3916_v61, %v1372_v9 }
 0x1a4   : > { %v1375_v63 = vadd.f32 %v3861_v10, %v3803_v8  ;;  %v1493_v14 = vmax.bf16 %v4688_v6, %v1486_v12 }
 0x1a6   : > { %v1464_v0 = vadd.f32 %v3919_v13, %v1375_v63  ;;  %4010 = vmatmul.mubr.bf16.gmra.mxu1 %v1493_v14  ;;  %v4367_v14 = vld [vmem:[%s5530_s9] sm:$0x3f]  }
 0x1a7   : > { %4013 = vmatprep.mubr.msk.bf16.mxu1 %vm4687_vm0, %v4686_v4 }
 0x1a8   : > { %v1473_v57 = vpack.c.bf16 %v1464_v0, %v1461_v47  ;;  %v2030_v47 = vsel %vm1879_vm1, %v4367_v14, 0  ;;  %v1685_v0 = vld [vmem:[%s5527_s6] sm:$0x1] }
 0x1aa   : > { %v1487_v59 = vadd.bf16 %v5073_v31, %v1473_v57  ;;  %v1511_v31 = vld [vmem:[%s5525_s4] sm:$0x1]  ;;  %v1829_v57 = vpack.i.b16 %v1685_v0, %v1685_v0 }
 0x1ab   : > { %v1657_v49 = vpack.i.b16 %v1511_v31, %v1511_v31 }
 0x1ac   : > { %v1494_v62 = vmax.bf16 %v4688_v6, %v1487_v59  ;;  %v1834_v1 = vrot.slane %v1829_v57, %v5070_v21 }
 0x1ad   : > { %v1662_v53 = vrot.slane %v1657_v49, %v5070_v21 }
 0x1ae   : > { %4014 = vmatmul.mubr.bf16.gmra.mxu1 %v1494_v62 }
 0x1af   : > { %4055 = vmatprep.mubr.msk.bf16.mxu1 %vm4687_vm0, %v4686_v4 }
 0x23e   : > { %v1594_v15 = vpop.f32.mrf.mxu1 }
 0x240   : > { %v3991_v51 = vpop.f32.mrf.mxu1 }
 0x242   : > { %v1597_v16 = vpop.f32.mrf.mxu1 }
 0x243   : > { %v1649_v17 = vpack.c.bf16 %v1597_v16, %v1594_v15 }
 0x244   : > { %v3992_v18 = vpop.f32.mrf.mxu1 }
 0x245   : > { %v1663_v19 = vadd.bf16 %v1662_v53, %v1649_v17 }
 0x246   : > { %v1602_v20 = vpop.f32.mrf.mxu1 }
 0x247   : > { %v1670_v22 = vmax.bf16 %v4688_v6, %v1663_v19 }
 0x248   : > { %v3995_v23 = vpop.f32.mrf.mxu1 }
 0x249   : > { %4026 = vmatmul.mubr.msk.bf16.vlgmr.msra.gmra.mxu0 %vm1710_vm2, %v1670_v22 }
 0x24a   : > { %v1605_v24 = vpop.f32.mrf.mxu1  ;;  %4029 = vmatprep.mubr.msk.bf16.mxu0 %vm4687_vm0, %v4686_v4  ;;  %4084 = vmatpush3.bf16.msra.mxu0 %v2030_v47 }
 0x24b   : > { %v1650_v25 = vpack.c.bf16 %v1605_v24, %v1602_v20 }
 0x24c   : > { %v3996_v26 = vpop.f32.mrf.mxu1 }
 0x24d   : > { %v1664_v40 = vadd.bf16 %v1662_v53, %v1650_v25 }
 0x24e   : > { %v1610_v42 = vpop.f32.mrf.mxu1 }
 0x24f   : > { %v1671_v27 = vmax.bf16 %v4688_v6, %v1664_v40 }
 0x250   : > { %v3999_v28 = vpop.f32.mrf.mxu1 }
 0x251   : > { %4030 = vmatmul.mubr.msk.bf16.gmra.mxu0 %vm1710_vm2, %v1671_v27 }
 0x252   : > { %v1613_v29 = vpop.f32.mrf.mxu1  ;;  %4033 = vmatprep.mubr.msk.bf16.mxu0 %vm4687_vm0, %v4686_v4 }
 0x253   : > { %v1651_v44 = vpack.c.bf16 %v1613_v29, %v1610_v42 }
 0x254   : > { %v4000_v46 = vpop.f32.mrf.mxu1 }
 0x255   : > { %v1665_v30 = vadd.bf16 %v1662_v53, %v1651_v44 }
 0x256   : > { %v1618_v32 = vpop.f32.mrf.mxu1 }
 0x257   : > { %v1672_v55 = vmax.bf16 %v4688_v6, %v1665_v30 }
 0x258   : > { %v4003_v56 = vpop.f32.mrf.mxu1 }
 0x259   : > { %4034 = vmatmul.mubr.msk.bf16.gmra.mxu0 %vm1710_vm2, %v1672_v55 }
 0x25a   : > { %v1621_v33 = vpop.f32.mrf.mxu1  ;;  %4037 = vmatprep.mubr.msk.bf16.mxu0 %vm4687_vm0, %v4686_v4 }
 0x25b   : > { %v1652_v34 = vpack.c.bf16 %v1621_v33, %v1618_v32 }
 0x25c   : > { %v4004_v35 = vpop.f32.mrf.mxu1 }
 0x25d   : > { %v1666_v58 = vadd.bf16 %v1662_v53, %v1652_v34 }
 0x25e   : > { %v1626_v60 = vpop.f32.mrf.mxu1 }
 0x25f   : > { %v1673_v36 = vmax.bf16 %v4688_v6, %v1666_v58 }
 0x260   : > { %v4007_v37 = vpop.f32.mrf.mxu1 }
 0x261   : > { %4038 = vmatmul.mubr.msk.bf16.gmra.mxu0 %vm1710_vm2, %v1673_v36 }
 0x262   : > { %v1629_v38 = vpop.f32.mrf.mxu1  ;;  %4041 = vmatprep.mubr.msk.bf16.mxu0 %vm4687_vm0, %v4686_v4 }
 0x263   : > { %v1653_v39 = vpack.c.bf16 %v1629_v38, %v1626_v60 }
 0x264   : > { %v4008_v41 = vpop.f32.mrf.mxu1 }
 0x265   : > { %v1667_v48 = vadd.bf16 %v1662_v53, %v1653_v39 }
 0x266   : > { %v1634_v50 = vpop.f32.mrf.mxu1 }
 0x267   : > { %v1674_v43 = vmax.bf16 %v4688_v6, %v1667_v48 }
 0x268   : > { %v4011_v45 = vpop.f32.mrf.mxu1 }
 0x269   : > { %4042 = vmatmul.mubr.msk.bf16.gmra.mxu0 %vm1710_vm2, %v1674_v43 }
 0x26a   : > { %v1637_v3 = vpop.f32.mrf.mxu1  ;;  %4045 = vmatprep.mubr.msk.bf16.mxu0 %vm4687_vm0, %v4686_v4 }
 0x26b   : > { %v1654_v52 = vpack.c.bf16 %v1637_v3, %v1634_v50 }
 0x26c   : > { %v4012_v54 = vpop.f32.mrf.mxu1 }
 0x26d   : > { %v1668_v5 = vadd.bf16 %v1662_v53, %v1654_v52 }
 0x26e   : > { %v1642_v7 = vpop.f32.mrf.mxu1 }
 0x26f   : > { %v1675_v8 = vmax.bf16 %v4688_v6, %v1668_v5 }
 0x270   : > { %v4015_v9 = vpop.f32.mrf.mxu1 }
 0x271   : > { %4046 = vmatmul.mubr.msk.bf16.gmra.mxu0 %vm1710_vm2, %v1675_v8  ;;  %v4368_v9 = vld [vmem:[%s5532_s11 + $0x18] sm:$0xff]  }
 0x272   : > { %v1645_v10 = vpop.f32.mrf.mxu1  ;;  %4049 = vmatprep.mubr.msk.bf16.mxu0 %vm4687_vm0, %v4686_v4 }
 0x273   : > { %v1655_v12 = vpack.c.bf16 %v1645_v10, %v1642_v7  ;;  %v4369_v10 = vld [vmem:[%s5532_s11 + $0x10] sm:$0xff]  }
 0x274   : > { %v4016_v61 = vpop.f32.mrf.mxu1 }
 0x275   : > { %v1669_v63 = vadd.bf16 %v1662_v53, %v1655_v12  ;;  %v4370_v12 = vld [vmem:[%s5532_s11 + $0x8] sm:$0xff]   ;;  %v4371_v61 = vld [vmem:[%s5532_s11] sm:$0xff]  }
 0x277   : > { %v1676_v13 = vmax.bf16 %v4688_v6, %v1669_v63  ;;  %v1851_v63 = vld [vmem:[%s5529_s8] sm:$0x1] }
 0x279   : > { %4050 = vmatmul.mubr.msk.bf16.gmra.mxu0 %vm1710_vm2, %v1676_v13  ;;  %v1980_v13 = vpack.i.b16 %v1851_v63, %v1851_v63  ;;  %v4381_v63 = vld [vmem:[#allocation7 + $0xc0] ss:$24 sps:$4 sm:$0xff]  }
 0x27a   : > { %4085 = vmatprep.mubr.msk.bf16.mxu0 %vm4687_vm0, %v4686_v4 }
 0x27b   : > { %v1985_v0 = vrot.slane %v1980_v13, %v5070_v21  ;;  %v4389_v13 = vld [vmem:[#allocation7 + $0x94] ss:$24 sps:$4 sm:$0xff]  }
 0x309   : > { %v1766_v59 = vpop.f32.mrf.mxu0 }
 0x30b   : > { %v4027_v62 = vpop.f32.mrf.mxu0 }
 0x30d   : > { %v1769_v2 = vpop.f32.mrf.mxu0 }
 0x30e   : > { %v1821_v31 = vpack.c.bf16 %v1769_v2, %v1766_v59 }
 0x30f   : > { %v4028_v49 = vpop.f32.mrf.mxu0 }
 0x310   : > { %v1835_v15 = vadd.bf16 %v1834_v1, %v1821_v31 }
 0x311   : > { %v1774_v51 = vpop.f32.mrf.mxu0 }
 0x312   : > { %v1842_v53 = vmax.bf16 %v4688_v6, %v1835_v15 }
 0x313   : > { %v4031_v16 = vpop.f32.mrf.mxu0 }
 0x314   : > { %4056 = vmatmul.mubr.msk.bf16.vlgmr.msra.gmra.mxu1 %vm1857_vm3, %v1842_v53 }
 0x315   : > { %v1777_v17 = vpop.f32.mrf.mxu0  ;;  %4059 = vmatprep.mubr.msk.bf16.mxu1 %vm4687_vm0, %v4686_v4  ;;  %4114 = vmatpush3.bf16.msra.mxu1 %v4368_v9  ;;  %v4386_v9 = vld [vmem:[#allocation7 + $0x15c] ss:$24 sps:$4 sm:$0xff]  }
 0x316   : > { %v1822_v18 = vpack.c.bf16 %v1777_v17, %v1774_v51  ;;  %4115 = vmatprep.subr.bf16.mxu1 %v4686_v4 }
 0x317   : > { %v4032_v19 = vpop.f32.mrf.mxu0 }
 0x318   : > { %v1836_v20 = vadd.bf16 %v1834_v1, %v1822_v18 }
 0x319   : > { %v1782_v22 = vpop.f32.mrf.mxu0  ;;  %4116 = vmatpush3.bf16.msra.mxu1 %v4369_v10  ;;  %v4380_v10 = vld [vmem:[#allocation7 + $0xf4] ss:$24 sps:$4 sm:$0xff]  }
 0x31a   : > { %v1843_v23 = vmax.bf16 %v4688_v6, %v1836_v20  ;;  %4117 = vmatprep.subr.bf16.mxu1 %v4686_v4 }
 0x31b   : > { %v4035_v24 = vpop.f32.mrf.mxu0 }
 0x31c   : > { %4060 = vmatmul.mubr.msk.bf16.gmra.mxu1 %vm1857_vm3, %v1843_v23 }
 0x31d   : > { %v1785_v25 = vpop.f32.mrf.mxu0  ;;  %4063 = vmatprep.mubr.msk.bf16.mxu1 %vm4687_vm0, %v4686_v4  ;;  %4118 = vmatpush3.bf16.msra.mxu1 %v4370_v12  ;;  %v4378_v12 = vld [vmem:[#allocation7 + $0xf0] ss:$24 sps:$4 sm:$0xff]  }
 0x31e   : > { %v1823_v26 = vpack.c.bf16 %v1785_v25, %v1782_v22  ;;  %4119 = vmatprep.subr.bf16.mxu1 %v4686_v4 }
 0x31f   : > { %v4036_v40 = vpop.f32.mrf.mxu0 }
 0x320   : > { %v1837_v42 = vadd.bf16 %v1834_v1, %v1823_v26 }
 0x321   : > { %v1790_v27 = vpop.f32.mrf.mxu0  ;;  %4120 = vmatpush3.bf16.msra.mxu1 %v4371_v61  ;;  %v4383_v61 = vld [vmem:[#allocation7 + $0xc4] ss:$24 sps:$4 sm:$0xff]  }
 0x322   : > { %v1844_v28 = vmax.bf16 %v4688_v6, %v1837_v42  ;;  %2712 = vmatprep.subr.bf16.mxu1 %v4386_v9 }
 0x323   : > { %v4039_v29 = vpop.f32.mrf.mxu0 }
 0x324   : > { %4064 = vmatmul.mubr.msk.bf16.gmra.mxu1 %vm1857_vm3, %v1844_v28 }
 0x325   : > { %v1793_v44 = vpop.f32.mrf.mxu0  ;;  %4067 = vmatprep.mubr.msk.bf16.mxu1 %vm4687_vm0, %v4686_v4 }
 0x326   : > { %v1824_v46 = vpack.c.bf16 %v1793_v44, %v1790_v27 }
 0x327   : > { %v4040_v30 = vpop.f32.mrf.mxu0 }
 0x328   : > { %v1838_v32 = vadd.bf16 %v1834_v1, %v1824_v46 }
 0x329   : > { %v1798_v55 = vpop.f32.mrf.mxu0 }
 0x32a   : > { %v1845_v56 = vmax.bf16 %v4688_v6, %v1838_v32 }
 0x32b   : > { %v4043_v33 = vpop.f32.mrf.mxu0 }
 0x32c   : > { %4068 = vmatmul.mubr.msk.bf16.gmra.mxu1 %vm1857_vm3, %v1845_v56 }
 0x32d   : > { %v1801_v34 = vpop.f32.mrf.mxu0  ;;  %4071 = vmatprep.mubr.msk.bf16.mxu1 %vm4687_vm0, %v4686_v4 }
 0x32e   : > { %v1825_v35 = vpack.c.bf16 %v1801_v34, %v1798_v55 }
 0x32f   : > { %v4044_v58 = vpop.f32.mrf.mxu0 }
 0x330   : > { %v1839_v60 = vadd.bf16 %v1834_v1, %v1825_v35 }
 0x331   : > { %v1806_v36 = vpop.f32.mrf.mxu0 }
 0x332   : > { %v1846_v37 = vmax.bf16 %v4688_v6, %v1839_v60 }
 0x333   : > { %v4047_v38 = vpop.f32.mrf.mxu0 }
 0x334   : > { %4072 = vmatmul.mubr.msk.bf16.gmra.mxu1 %vm1857_vm3, %v1846_v37 }
 0x335   : > { %v1809_v39 = vpop.f32.mrf.mxu0  ;;  %4075 = vmatprep.mubr.msk.bf16.mxu1 %vm4687_vm0, %v4686_v4 }
 0x336   : > { %v1826_v41 = vpack.c.bf16 %v1809_v39, %v1806_v36 }
 0x337   : > { %v4048_v48 = vpop.f32.mrf.mxu0 }
 0x338   : > { %v1840_v50 = vadd.bf16 %v1834_v1, %v1826_v41 }
 0x339   : > { %v1814_v43 = vpop.f32.mrf.mxu0 }
 0x33a   : > { %v1847_v45 = vmax.bf16 %v4688_v6, %v1840_v50 }
 0x33b   : > { %v4051_v3 = vpop.f32.mrf.mxu0 }
 0x33c   : > { %4076 = vmatmul.mubr.msk.bf16.gmra.mxu1 %vm1857_vm3, %v1847_v45 }
 0x33d   : > { %v1817_v52 = vpop.f32.mrf.mxu0  ;;  %4079 = vmatprep.mubr.msk.bf16.mxu1 %vm4687_vm0, %v4686_v4 }
 0x33e   : > { %v1827_v54 = vpack.c.bf16 %v1817_v52, %v1814_v43 }
 0x33f   : > { %v4052_v5 = vpop.f32.mrf.mxu0 }
 0x340   : > { %v1841_v7 = vadd.bf16 %v1834_v1, %v1827_v54  ;;  %v4372_v54 = vld [vmem:[#allocation7 + $0x150] ss:$24 sps:$4 sm:$0xff]   ;;  %v4374_v5 = vld [vmem:[#allocation7 + $0x154] ss:$24 sps:$4 sm:$0xff]  }
 0x341   : > { %2609 = vmatprep.subr.bf16.mxu0 %v4374_v5 }
 0x342   : > { %v1848_v8 = vmax.bf16 %v4688_v6, %v1841_v7  ;;  %v4377_v7 = vld [vmem:[#allocation7 + $0x124] ss:$24 sps:$4 sm:$0xff]  }
 0x344   : > { %4080 = vmatmul.mubr.msk.bf16.gmra.mxu1 %vm1857_vm3, %v1848_v8  ;;  %v4375_v8 = vld [vmem:[#allocation7 + $0x120] ss:$24 sps:$4 sm:$0xff]  }
 0x345   : > { %4121 = vmatprep.mubr.msk.bf16.mxu1 %vm4687_vm0, %v4686_v4 }
 0x3d4   : > { %v1917_v14 = vpop.f32.mrf.mxu1 }
 0x3d6   : > { %v4057_v47 = vpop.f32.mrf.mxu1 }
 0x3d7   : > { %v4398_v47 = vld [vmem:[#allocation7 + $0x64] ss:$24 sps:$4 sm:$0xff]  }
 0x3d8   : > { %v1920_v57 = vpop.f32.mrf.mxu1 }
 0x3d9   : > { %v1972_v59 = vpack.c.bf16 %v1920_v57, %v1917_v14  ;;  %v4387_v14 = vld [vmem:[#allocation7 + $0x90] ss:$24 sps:$4 sm:$0xff]   ;;  %v4407_v57 = vld [vmem:[#allocation7 + $0x34] ss:$24 sps:$4 sm:$0xff]  }
 0x3da   : > { %v4058_v62 = vpop.f32.mrf.mxu1 }
 0x3db   : > { %v1986_v1 = vadd.bf16 %v1985_v0, %v1972_v59  ;;  %v4405_v59 = vld [vmem:[#allocation7 + $0x30] ss:$24 sps:$4 sm:$0xff]   ;;  %v2002_v62 = vld [vmem:[%s5563_s27] sm:$0x1] }
 0x3dc   : > { %v1925_v2 = vpop.f32.mrf.mxu1 }
 0x3dd   : > { %v1993_v31 = vmax.bf16 %v4688_v6, %v1986_v1  ;;  %v2129_v1 = vpack.i.b16 %v2002_v62, %v2002_v62 }
 0x3de   : > { %v4061_v49 = vpop.f32.mrf.mxu1 }
 0x3df   : > { %4086 = vmatmul.mubr.msk.bf16.vlgmr.msra.gmra.mxu0 %vm1857_vm3, %v1993_v31  ;;  %v5246_v49 = vrot.slane %v2129_v1, %v5070_v21 }
 0x3e0   : > { %v1928_v15 = vpop.f32.mrf.mxu1  ;;  %4089 = vmatprep.mubr.msk.bf16.mxu0 %vm4687_vm0, %v4686_v4  ;;  %2610 = vmatpush1.bf16.msra.mxu0 %v4372_v54 }
 0x3e1   : > { %v1973_v51 = vpack.c.bf16 %v1928_v15, %v1925_v2  ;;  %2611 = vmatprep.subr.bf16.mxu0 %v4377_v7 }
 0x3e2   : > { %v4062_v53 = vpop.f32.mrf.mxu1 }
 0x3e3   : > { %v1987_v16 = vadd.bf16 %v1985_v0, %v1973_v51 }
 0x3e4   : > { %v1933_v17 = vpop.f32.mrf.mxu1  ;;  %2612 = vmatpush1.bf16.msra.mxu0 %v4375_v8 }
 0x3e5   : > { %v1994_v18 = vmax.bf16 %v4688_v6, %v1987_v16  ;;  %2613 = vmatprep.subr.bf16.mxu0 %v4380_v10 }
 0x3e6   : > { %v4065_v19 = vpop.f32.mrf.mxu1 }
 0x3e7   : > { %4090 = vmatmul.mubr.msk.bf16.gmra.mxu0 %vm1857_vm3, %v1994_v18  ;;  %v4384_v18 = vld [vmem:[#allocation7 + $0x158] ss:$24 sps:$4 sm:$0xff]  }
 0x3e8   : > { %v1936_v20 = vpop.f32.mrf.mxu1  ;;  %4093 = vmatprep.mubr.msk.bf16.mxu0 %vm4687_vm0, %v4686_v4  ;;  %2614 = vmatpush1.bf16.msra.mxu0 %v4378_v12 }
 0x3e9   : > { %v1974_v22 = vpack.c.bf16 %v1936_v20, %v1933_v17  ;;  %2615 = vmatprep.subr.bf16.mxu0 %v4383_v61  ;;  %v4392_v20 = vld [vmem:[#allocation7 + $0x12c] ss:$24 sps:$4 sm:$0xff]  }
 0x3ea   : > { %v4066_v23 = vpop.f32.mrf.mxu1 }
 0x3eb   : > { %v1988_v24 = vadd.bf16 %v1985_v0, %v1974_v22 }
 0x3ec   : > { %v1941_v25 = vpop.f32.mrf.mxu1  ;;  %2616 = vmatpush1.bf16.msra.mxu0 %v4381_v63 }
 0x3ed   : > { %v1995_v26 = vmax.bf16 %v4688_v6, %v1988_v24  ;;  %2617 = vmatprep.subr.bf16.mxu0 %v4389_v13  ;;  %v4390_v24 = vld [vmem:[#allocation7 + $0x128] ss:$24 sps:$4 sm:$0xff]  }
 0x3ee   : > { %v4069_v40 = vpop.f32.mrf.mxu1 }
 0x3ef   : > { %4094 = vmatmul.mubr.msk.bf16.gmra.mxu0 %vm1857_vm3, %v1995_v26  ;;  %v4395_v26 = vld [vmem:[#allocation7 + $0xfc] ss:$24 sps:$4 sm:$0xff]  }
 0x3f0   : > { %v1944_v42 = vpop.f32.mrf.mxu1  ;;  %4097 = vmatprep.mubr.msk.bf16.mxu0 %vm4687_vm0, %v4686_v4  ;;  %2618 = vmatpush1.bf16.msra.mxu0 %v4387_v14 }
 0x3f1   : > { %v1975_v27 = vpack.c.bf16 %v1944_v42, %v1941_v25  ;;  %2619 = vmatprep.subr.bf16.mxu0 %v4398_v47 }
 0x3f2   : > { %v4070_v28 = vpop.f32.mrf.mxu1 }
 0x3f3   : > { %v1989_v29 = vadd.bf16 %v1985_v0, %v1975_v27  ;;  %v4393_v28 = vld [vmem:[#allocation7 + $0xf8] ss:$24 sps:$4 sm:$0xff]  }
 0x3f4   : > { %v1949_v44 = vpop.f32.mrf.mxu1 }
 0x3f5   : > { %v1996_v46 = vmax.bf16 %v4688_v6, %v1989_v29 }
 0x3f6   : > { %v4073_v30 = vpop.f32.mrf.mxu1 }
 0x3f7   : > { %4098 = vmatmul.mubr.msk.bf16.gmra.mxu0 %vm1857_vm3, %v1996_v46 }
 0x3f8   : > { %v1952_v32 = vpop.f32.mrf.mxu1  ;;  %4101 = vmatprep.mubr.msk.bf16.mxu0 %vm4687_vm0, %v4686_v4 }
 0x3f9   : > { %v1976_v55 = vpack.c.bf16 %v1952_v32, %v1949_v44  ;;  %v4401_v44 = vld [vmem:[#allocation7 + $0xcc] ss:$24 sps:$4 sm:$0xff]   ;;  %v4399_v32 = vld [vmem:[#allocation7 + $0xc8] ss:$24 sps:$4 sm:$0xff]  }
 0x3fa   : > { %v4074_v56 = vpop.f32.mrf.mxu1 }
 0x3fb   : > { %v1990_v33 = vadd.bf16 %v1985_v0, %v1976_v55  ;;  %v4404_v56 = vld [vmem:[#allocation7 + $0x9c] ss:$24 sps:$4 sm:$0xff]  }
 0x3fc   : > { %v1957_v34 = vpop.f32.mrf.mxu1 }
 0x3fd   : > { %v1997_v35 = vmax.bf16 %v4688_v6, %v1990_v33 }
 0x3fe   : > { %v4077_v58 = vpop.f32.mrf.mxu1 }
 0x3ff   : > { %4102 = vmatmul.mubr.msk.bf16.gmra.mxu0 %vm1857_vm3, %v1997_v35  ;;  %v4402_v58 = vld [vmem:[#allocation7 + $0x98] ss:$24 sps:$4 sm:$0xff]  }
 0x400   : > { %v1960_v60 = vpop.f32.mrf.mxu1  ;;  %4105 = vmatprep.mubr.msk.bf16.mxu0 %vm4687_vm0, %v4686_v4 }
 0x401   : > { %v1977_v36 = vpack.c.bf16 %v1960_v60, %v1957_v34 }
 0x402   : > { %v4078_v37 = vpop.f32.mrf.mxu1 }
 0x403   : > { %v1991_v38 = vadd.bf16 %v1985_v0, %v1977_v36  ;;  %v4410_v36 = vld [vmem:[#allocation7 + $0x6c] ss:$24 sps:$4 sm:$0xff]  }
 0x404   : > { %v1965_v39 = vpop.f32.mrf.mxu1 }
 0x405   : > { %v1998_v41 = vmax.bf16 %v4688_v6, %v1991_v38 }
 0x406   : > { %v4081_v48 = vpop.f32.mrf.mxu1 }
 0x407   : > { %4106 = vmatmul.mubr.msk.bf16.gmra.mxu0 %vm1857_vm3, %v1998_v41 }
 0x408   : > { %v1968_v50 = vpop.f32.mrf.mxu1  ;;  %4109 = vmatprep.mubr.msk.bf16.mxu0 %vm4687_vm0, %v4686_v4 }
 0x409   : > { %v1978_v43 = vpack.c.bf16 %v1968_v50, %v1965_v39  ;;  %v4408_v39 = vld [vmem:[#allocation7 + $0x68] ss:$24 sps:$4 sm:$0xff]  }
 0x40a   : > { %v4082_v45 = vpop.f32.mrf.mxu1 }
 0x40b   : > { %v1992_v3 = vadd.bf16 %v1985_v0, %v1978_v43  ;;  %v4396_v0 = vld [vmem:[#allocation7 + $0x60] ss:$24 sps:$4 sm:$0xff]  }
 0x40c   : > { %2620 = vmatpush1.bf16.msra.mxu0 %v4396_v0 }
 0x40d   : > { %v1999_v52 = vmax.bf16 %v4688_v6, %v1992_v3  ;;  %2621 = vmatprep.subr.bf16.mxu0 %v4407_v57 }
 0x40f   : > { %4110 = vmatmul.mubr.msk.bf16.gmra.mxu0 %vm1857_vm3, %v1999_v52 }
 0x410   : > { %2641 = vmatprep.mubr.bf16.mxu0 %v4688_v6  ;;  %2622 = vmatpush1.bf16.msra.mxu0 %v4405_v59 }
 0x49f   : > { %v2066_v2 = vpop.f32.mrf.mxu0 }
 0x4a1   : > { %v4087_v31 = vpop.f32.mrf.mxu0 }
 0x4a2   : > { %v4416_v31 = vld [vmem:[#allocation7 + $0x3c] ss:$24 sps:$4 sm:$0xff]  }
 0x4a3   : > { %v2069_v15 = vpop.f32.mrf.mxu0 }
 0x4a4   : > { %v2121_v51 = vpack.c.bf16 %v2069_v15, %v2066_v2  ;;  %v4411_v15 = vld [vmem:[#allocation7] ss:$24 sps:$4 sm:$0xff]  }
 0x4a5   : > { %v4088_v53 = vpop.f32.mrf.mxu0 }
 0x4a6   : > { %v2135_v16 = vadd.bf16 %v5246_v49, %v2121_v51  ;;  %v4413_v51 = vld [vmem:[#allocation7 + $0x4] ss:$24 sps:$4 sm:$0xff]   ;;  %v4414_v53 = vld [vmem:[#allocation7 + $0x38] ss:$24 sps:$4 sm:$0xff]  }
 0x4a7   : > { %v2074_v17 = vpop.f32.mrf.mxu0  ;;  %2623 = vmatprep.subr.bf16.mxu0 %v4413_v51 }
 0x4a8   : > { %v2142_v19 = vmax.bf16 %v4688_v6, %v2135_v16  ;;  %2624 = vmatpush1.bf16.msra.mxu0 %v4411_v15  ;;  %v4419_v16 = vld [vmem:[#allocation7 + $0xc] ss:$24 sps:$4 sm:$0xff]  }
 0x4a9   : > { %v4091_v22 = vpop.f32.mrf.mxu0 }
 0x4aa   : > { %4122 = vmatmul.mubr.msk.bf16.vlgmr.msra.gmra.mxu1 %vm1710_vm2, %v2142_v19 }
 0x4ab   : > { %v2077_v23 = vpop.f32.mrf.mxu0  ;;  %4125 = vmatprep.mubr.msk.bf16.mxu1 %vm4687_vm0, %v4686_v4  ;;  %2713 = vmatpush1.bf16.msra.mxu1 %v4384_v18 }
 0x4ac   : > { %v2122_v25 = vpack.c.bf16 %v2077_v23, %v2074_v17  ;;  %2714 = vmatprep.subr.bf16.mxu1 %v4392_v20  ;;  %v4422_v17 = vld [vmem:[#allocation7 + $0x164] ss:$24 sps:$4 sm:$0xff]  }
 0x4ad   : > { %v4092_v40 = vpop.f32.mrf.mxu0  ;;  %2815 = vmatprep.subr.bf16.mxu0 %v4422_v17 }
 0x4ae   : > { %v2136_v42 = vadd.bf16 %v5246_v49, %v2122_v25 }
 0x4af   : > { %v2082_v27 = vpop.f32.mrf.mxu0  ;;  %2715 = vmatpush1.bf16.msra.mxu1 %v4390_v24 }
 0x4b0   : > { %v2143_v29 = vmax.bf16 %v4688_v6, %v2136_v42  ;;  %2716 = vmatprep.subr.bf16.mxu1 %v4395_v26  ;;  %v4420_v42 = vld [vmem:[#allocation7 + $0x160] ss:$24 sps:$4 sm:$0xff]  }
 0x4b1   : > { %v4095_v46 = vpop.f32.mrf.mxu0 }
 0x4b2   : > { %4126 = vmatmul.mubr.msk.bf16.gmra.mxu1 %vm1710_vm2, %v2143_v29  ;;  %v4423_v46 = vld [vmem:[#allocation7 + $0x130] ss:$24 sps:$4 sm:$0xff]  }
 0x4b3   : > { %v2085_v30 = vpop.f32.mrf.mxu0  ;;  %4129 = vmatprep.mubr.msk.bf16.mxu1 %vm4687_vm0, %v4686_v4  ;;  %2717 = vmatpush1.bf16.msra.mxu1 %v4393_v28  ;;  %v4425_v28 = vld [vmem:[#allocation7 + $0x134] ss:$24 sps:$4 sm:$0xff]  }
 0x4b4   : > { %v2123_v55 = vpack.c.bf16 %v2085_v30, %v2082_v27  ;;  %2718 = vmatprep.subr.bf16.mxu1 %v4401_v44 }
 0x4b5   : > { %v4096_v33 = vpop.f32.mrf.mxu0 }
 0x4b6   : > { %v2137_v34 = vadd.bf16 %v5246_v49, %v2123_v55 }
 0x4b7   : > { %v2090_v35 = vpop.f32.mrf.mxu0  ;;  %2719 = vmatpush1.bf16.msra.mxu1 %v4399_v32  ;;  %v4428_v32 = vld [vmem:[#allocation7 + $0x104] ss:$24 sps:$4 sm:$0xff]  }
 0x4b8   : > { %v2144_v60 = vmax.bf16 %v4688_v6, %v2137_v34  ;;  %2720 = vmatprep.subr.bf16.mxu1 %v4404_v56  ;;  %v4426_v34 = vld [vmem:[#allocation7 + $0x100] ss:$24 sps:$4 sm:$0xff]  }
 0x4b9   : > { %v4099_v37 = vpop.f32.mrf.mxu0 }
 0x4ba   : > { %4130 = vmatmul.mubr.msk.bf16.gmra.mxu1 %vm1710_vm2, %v2144_v60  ;;  %v4429_v37 = vld [vmem:[#allocation7 + $0xd0] ss:$24 sps:$4 sm:$0xff]  }
 0x4bb   : > { %v2093_v38 = vpop.f32.mrf.mxu0  ;;  %4133 = vmatprep.mubr.msk.bf16.mxu1 %vm4687_vm0, %v4686_v4  ;;  %2721 = vmatpush1.bf16.msra.mxu1 %v4402_v58  ;;  %v4431_v58 = vld [vmem:[#allocation7 + $0xd4] ss:$24 sps:$4 sm:$0xff]  }
 0x4bc   : > { %v2124_v41 = vpack.c.bf16 %v2093_v38, %v2090_v35  ;;  %2722 = vmatprep.subr.bf16.mxu1 %v4410_v36 }
 0x4bd   : > { %v4100_v48 = vpop.f32.mrf.mxu0 }
 0x4be   : > { %v2138_v50 = vadd.bf16 %v5246_v49, %v2124_v41 }
 0x4bf   : > { %v2098_v43 = vpop.f32.mrf.mxu0  ;;  %2723 = vmatpush1.bf16.msra.mxu1 %v4408_v39  ;;  %v4434_v39 = vld [vmem:[#allocation7 + $0xa4] ss:$24 sps:$4 sm:$0xff]  }
 0x4c0   : > { %v2145_v45 = vmax.bf16 %v4688_v6, %v2138_v50  ;;  %2724 = vmatprep.subr.bf16.mxu1 %v4416_v31 }
 0x4c1   : > { %v4103_v3 = vpop.f32.mrf.mxu0 }
 0x4c2   : > { %4134 = vmatmul.mubr.msk.bf16.gmra.mxu1 %vm1710_vm2, %v2145_v45  ;;  %v4432_v45 = vld [vmem:[#allocation7 + $0xa0] ss:$24 sps:$4 sm:$0xff]  }
 0x4c3   : > { %v2101_v52 = vpop.f32.mrf.mxu0  ;;  %4137 = vmatprep.mubr.msk.bf16.mxu1 %vm4687_vm0, %v4686_v4  ;;  %2725 = vmatpush1.bf16.msra.mxu1 %v4414_v53 }
 0x4c4   : > { %v2125_v54 = vpack.c.bf16 %v2101_v52, %v2098_v43  ;;  %2726 = vmatprep.subr.bf16.mxu1 %v4419_v16  ;;  %v4437_v52 = vld [vmem:[#allocation7 + $0x74] ss:$24 sps:$4 sm:$0xff]  }
 0x4c5   : > { %v4104_v5 = vpop.f32.mrf.mxu0 }
 0x4c6   : > { %v2139_v7 = vadd.bf16 %v5246_v49, %v2125_v54 }
 0x4c7   : > { %v2106_v8 = vpop.f32.mrf.mxu0 }
 0x4c8   : > { %v2146_v9 = vmax.bf16 %v4688_v6, %v2139_v7  ;;  %v4435_v7 = vld [vmem:[#allocation7 + $0x70] ss:$24 sps:$4 sm:$0xff]  }
 0x4c9   : > { %v4107_v10 = vpop.f32.mrf.mxu0 }
 0x4ca   : > { %4138 = vmatmul.mubr.msk.bf16.gmra.mxu1 %vm1710_vm2, %v2146_v9  ;;  %v4440_v9 = vld [vmem:[#allocation7 + $0x44] ss:$24 sps:$4 sm:$0xff]  }
 0x4cb   : > { %v2109_v12 = vpop.f32.mrf.mxu0  ;;  %4141 = vmatprep.mubr.msk.bf16.mxu1 %vm4687_vm0, %v4686_v4 }
 0x4cc   : > { %v2126_v61 = vpack.c.bf16 %v2109_v12, %v2106_v8 }
 0x4cd   : > { %v4108_v63 = vpop.f32.mrf.mxu0 }
 0x4ce   : > { %v2140_v13 = vadd.bf16 %v5246_v49, %v2126_v61  ;;  %v4438_v63 = vld [vmem:[#allocation7 + $0x40] ss:$24 sps:$4 sm:$0xff]  }
 0x4cf   : > { %v2114_v14 = vpop.f32.mrf.mxu0 }
 0x4d0   : > { %v2147_v47 = vmax.bf16 %v4688_v6, %v2140_v13 }
 0x4d1   : > { %v4111_v0 = vpop.f32.mrf.mxu0 }
 0x4d2   : > { %4142 = vmatmul.mubr.msk.bf16.gmra.mxu1 %vm1710_vm2, %v2147_v47 }
 0x4d3   : > { %v2117_v57 = vpop.f32.mrf.mxu0  ;;  %4145 = vmatprep.mubr.msk.bf16.mxu1 %vm4687_vm0, %v4686_v4  ;;  %v4417_v4 = vld [vmem:[#allocation7 + $0x8] ss:$24 sps:$4 sm:$0xff]  }
 0x4d4   : > { %v2127_v59 = vpack.c.bf16 %v2117_v57, %v2114_v14  ;;  %2727 = vmatpush1.bf16.msra.mxu1 %v4417_v4  ;;  %v4443_v14 = vld [vmem:[#allocation7 + $0x14] ss:$24 sps:$4 sm:$0xff]   ;;  %v4441_v57 = vld [vmem:[#allocation7 + $0x10] ss:$24 sps:$4 sm:$0xff]  }
 0x4d5   : > { %v4112_v62 = vpop.f32.mrf.mxu0 }
 0x4d6   : > { %v2141_v1 = vadd.bf16 %v5246_v49, %v2127_v59  ;;  %v2157_v49 = vld [vmem:[%s5564_s30] sm:$0x1] }
 0x4d7   : > { %v2300_v18 = vpack.i.b16 %v2157_v49, %v2157_v49 }
 0x4d8   : > { %v2148_v2 = vmax.bf16 %v4688_v6, %v2141_v1 }
 0x4d9   : > { %v5286_v22 = vrot.slane %v2300_v18, %v5070_v21 }
 0x4da   : > { %4146 = vmatmul.mubr.msk.bf16.gmra.mxu1 %vm1710_vm2, %v2148_v2 }
 0x4db   : > { %2744 = vmatprep.mubr.bf16.mxu1 %v4688_v6 }
 0x56a   : > { %v2237_v19 = vpop.f32.mrf.mxu1 }
 0x56c   : > { %v4123_v20 = vpop.f32.mrf.mxu1 }
 0x56e   : > { %v2240_v23 = vpop.f32.mrf.mxu1 }
 0x56f   : > { %v2292_v24 = vpack.c.bf16 %v2240_v23, %v2237_v19 }
 0x570   : > { %v4124_v25 = vpop.f32.mrf.mxu1 }
 0x571   : > { %v2306_v26 = vadd.bf16 %v5286_v22, %v2292_v24 }
 0x572   : > { %v2245_v40 = vpop.f32.mrf.mxu1 }
 0x573   : > { %v5290_v27 = vmax.bf16 %v4688_v6, %v2306_v26 }
 0x574   : > { %v4127_v29 = vpop.f32.mrf.mxu1 }
 0x575   : > { %2642 = vmatmul.mubr.bf16.vlgmr.msra.gmra.mxu0 %v5290_v27  ;;  %2745 = vmatmul.mubr.bf16.vlgmr.msra.gmra.mxu1 %v5290_v27 }
 0x576   : > { %2816 = vmatpush1.bf16.msra.mxu0 %v4420_v42  ;;  %v2248_v44 = vpop.f32.mrf.mxu1  ;;  %2651 = vmatprep.mubr.bf16.mxu0 %v4688_v6  ;;  %v5342_v42 = vld [vmem:[%s5565_s29] sm:$0x3f] }
 0x577   : > { %v2293_v30 = vpack.c.bf16 %v2248_v44, %v2245_v40  ;;  %2817 = vmatprep.subr.bf16.mxu0 %v4425_v28  ;;  %2754 = vmatprep.mubr.bf16.mxu1 %v4688_v6 }
 0x578   : > { %v4128_v55 = vpop.f32.mrf.mxu1 }
 0x579   : > { %v2307_v56 = vadd.bf16 %v5286_v22, %v2293_v30 }
 0x57a   : > { %v2253_v33 = vpop.f32.mrf.mxu1  ;;  %2818 = vmatpush1.bf16.msra.mxu0 %v4423_v46 }
 0x57b   : > { %v5298_v35 = vmax.bf16 %v4688_v6, %v2307_v56  ;;  %2819 = vmatprep.subr.bf16.mxu0 %v4428_v32 }
 0x57c   : > { %v4131_v60 = vpop.f32.mrf.mxu1 }
 0x57d   : > { %2652 = vmatmul.mubr.bf16.gmra.mxu0 %v5298_v35  ;;  %2755 = vmatmul.mubr.bf16.gmra.mxu1 %v5298_v35 }
 0x57e   : > { %v2256_v36 = vpop.f32.mrf.mxu1  ;;  %2820 = vmatpush1.bf16.msra.mxu0 %v4426_v34  ;;  %2661 = vmatprep.mubr.bf16.mxu0 %v4688_v6 }
 0x57f   : > { %v2294_v38 = vpack.c.bf16 %v2256_v36, %v2253_v33  ;;  %2764 = vmatprep.mubr.bf16.mxu1 %v4688_v6  ;;  %2821 = vmatprep.subr.bf16.mxu0 %v4431_v58 }
 0x580   : > { %v4132_v41 = vpop.f32.mrf.mxu1 }
 0x581   : > { %v2308_v48 = vadd.bf16 %v5286_v22, %v2294_v38 }
 0x582   : > { %v2261_v50 = vpop.f32.mrf.mxu1  ;;  %2822 = vmatpush1.bf16.msra.mxu0 %v4429_v37 }
 0x583   : > { %v5306_v43 = vmax.bf16 %v4688_v6, %v2308_v48  ;;  %2823 = vmatprep.subr.bf16.mxu0 %v4434_v39 }
 0x584   : > { %v4135_v3 = vpop.f32.mrf.mxu1 }
 0x585   : > { %2662 = vmatmul.mubr.bf16.gmra.mxu0 %v5306_v43  ;;  %2765 = vmatmul.mubr.bf16.gmra.mxu1 %v5306_v43 }
 0x586   : > { %v2264_v54 = vpop.f32.mrf.mxu1  ;;  %2671 = vmatprep.mubr.bf16.mxu0 %v4688_v6  ;;  %2774 = vmatprep.mubr.bf16.mxu1 %v4688_v6 }
 0x587   : > { %v2295_v5 = vpack.c.bf16 %v2264_v54, %v2261_v50  ;;  %2824 = vmatpush1.bf16.msra.mxu0 %v4432_v45 }
 0x588   : > { %v4136_v8 = vpop.f32.mrf.mxu1  ;;  %2825 = vmatprep.subr.bf16.mxu0 %v4437_v52 }
 0x589   : > { %v2309_v10 = vadd.bf16 %v5286_v22, %v2295_v5 }
 0x58a   : > { %v2269_v12 = vpop.f32.mrf.mxu1 }
 0x58b   : > { %v2316_v61 = vmax.bf16 %v4688_v6, %v2309_v10  ;;  %2826 = vmatpush1.bf16.msra.mxu0 %v4435_v7 }
 0x58c   : > { %v4139_v13 = vpop.f32.mrf.mxu1  ;;  %2827 = vmatprep.subr.bf16.mxu0 %v4440_v9 }
 0x58d   : > { %2672 = vmatmul.mubr.bf16.gmra.mxu0 %v2316_v61  ;;  %2775 = vmatmul.mubr.bf16.gmra.mxu1 %v2316_v61 }
 0x58e   : > { %v2272_v47 = vpop.f32.mrf.mxu1  ;;  %2681 = vmatprep.mubr.bf16.mxu0 %v4688_v6  ;;  %2784 = vmatprep.mubr.bf16.mxu1 %v4688_v6 }
 0x58f   : > { %v2296_v0 = vpack.c.bf16 %v2272_v47, %v2269_v12  ;;  %2828 = vmatpush1.bf16.msra.mxu0 %v4438_v63 }
 0x590   : > { %v4140_v59 = vpop.f32.mrf.mxu1  ;;  %2829 = vmatprep.subr.bf16.mxu0 %v4443_v14 }
 0x591   : > { %v2310_v62 = vadd.bf16 %v5286_v22, %v2296_v0 }
 0x592   : > { %v2277_v1 = vpop.f32.mrf.mxu1 }
 0x593   : > { %v2317_v2 = vmax.bf16 %v4688_v6, %v2310_v62  ;;  %2830 = vmatpush1.bf16.msra.mxu0 %v4441_v57 }
 0x594   : > { %v4143_v31 = vpop.f32.mrf.mxu1 }
 0x595   : > { %2682 = vmatmul.mubr.bf16.gmra.mxu0 %v2317_v2  ;;  %2785 = vmatmul.mubr.bf16.gmra.mxu1 %v2317_v2 }
 0x596   : > { %v2280_v15 = vpop.f32.mrf.mxu1  ;;  %2691 = vmatprep.mubr.bf16.mxu0 %v4688_v6  ;;  %2794 = vmatprep.mubr.bf16.mxu1 %v4688_v6 }
 0x597   : > { %v2297_v51 = vpack.c.bf16 %v2280_v15, %v2277_v1 }
 0x598   : > { %v4144_v53 = vpop.f32.mrf.mxu1 }
 0x599   : > { %v2311_v16 = vadd.bf16 %v5286_v22, %v2297_v51 }
 0x59a   : > { %v2285_v4 = vpop.f32.mrf.mxu1 }
 0x59b   : > { %v2318_v17 = vmax.bf16 %v4688_v6, %v2311_v16 }
 0x59c   : > { %v4147_v49 = vpop.f32.mrf.mxu1 }
 0x59d   : > { %2692 = vmatmul.mubr.bf16.gmra.mxu0 %v2318_v17  ;;  %2795 = vmatmul.mubr.bf16.gmra.mxu1 %v2318_v17 }
 0x59e   : > { %v2288_v18 = vpop.f32.mrf.mxu1  ;;  %2701 = vmatprep.mubr.bf16.mxu0 %v4688_v6  ;;  %2804 = vmatprep.mubr.bf16.mxu1 %v4688_v6 }
 0x59f   : > { %v2298_v19 = vpack.c.bf16 %v2288_v18, %v2285_v4 }
 0x5a0   : > { %v4148_v20 = vpop.f32.mrf.mxu1 }
 0x5a1   : > { %v2312_v23 = vadd.bf16 %v5286_v22, %v2298_v19  ;;  %v4689_v22 = vmov 1966171168  }
 0x5a2   : > { %v2963_v25 = vunpack.c.l.s4 %v4689_v22 }
 0x5a3   : > { %v2319_v24 = vmax.bf16 %v4688_v6, %v2312_v23 }
 0x5a4   : > { %v2964_v26 = vunpack.c.0.s8 %v2963_v25 }
 0x5a5   : > { %2702 = vmatmul.mubr.bf16.gmra.mxu0 %v2319_v24  ;;  %2805 = vmatmul.mubr.bf16.gmra.mxu1 %v2319_v24 }
 0x5a6   : > { %2847 = vmatprep.mubr.bf16.mxu0 %v4688_v6  ;;  %v5337_v40 = vsub.s32 %v2964_v26, %v5067_v11 }
 0x5ad   : > { %2848 = vmatmul.mubr.bf16.vlgmr.msra.gmra.mxu0 %v5290_v27  ;;  %v2968_v27 = vrot.slane %v5342_v42, %v5337_v40 }
 0x5ae   : > { %2857 = vmatprep.mubr.bf16.mxu0 %v4688_v6 }
 0x5af   : > { %v2976_v28 = vcombine.high %v2968_v27, %v2968_v27  ;;  %v2984_v29 = vrot.slane %v2968_v27, %v5337_v40 }
 0x5b1   : > { %v3006_v44 = vcombine.high %v2984_v29, %v2984_v29  ;;  %v3009_v30 = vpack.i.b16 %v2984_v29, %v2984_v29 }
 0x5b3   : > { %v3023_v32 = vpack.i.b16 %v3006_v44, %v3006_v44  ;;  %v5349_v58 = vrot.slane %v3009_v30, %v5070_v21 }
 0x5b5   : > { %2858 = vmatmul.mubr.bf16.gmra.mxu0 %v5298_v35  ;;  %v5352_v60 = vrot.slane %v3023_v32, %v5070_v21 }
 0x5b6   : > { %2867 = vmatprep.mubr.bf16.mxu0 %v4688_v6 }
 0x5bd   : > { %2868 = vmatmul.mubr.bf16.gmra.mxu0 %v5306_v43 }
 0x5be   : > { %2877 = vmatprep.mubr.bf16.mxu0 %v4688_v6 }
 0x5c5   : > { %2878 = vmatmul.mubr.bf16.gmra.mxu0 %v2316_v61 }
 0x5c6   : > { %2887 = vmatprep.mubr.bf16.mxu0 %v4688_v6 }
 0x5cd   : > { %2888 = vmatmul.mubr.bf16.gmra.mxu0 %v2317_v2 }
 0x5ce   : > { %2897 = vmatprep.mubr.bf16.mxu0 %v4688_v6 }
 0x5d5   : > { %2898 = vmatmul.mubr.bf16.gmra.mxu0 %v2318_v17 }
 0x5d6   : > { %2907 = vmatprep.mubr.bf16.mxu0 %v4688_v6  ;;  %v2998_v6 = vrot.slane %v2976_v28, %v5337_v40 }
 0x5d8   : > { %v3007_v46 = vcombine.high %v2998_v6, %v2998_v6  ;;  %v3016_v56 = vpack.i.b16 %v2998_v6, %v2998_v6 }
 0x5da   : > { %v3030_v33 = vpack.i.b16 %v3007_v46, %v3007_v46  ;;  %v5355_v41 = vrot.slane %v3016_v56, %v5070_v21 }
 0x5dc   : > { %v5358_v48 = vrot.slane %v3030_v33, %v5070_v21 }
 0x5dd   : > { %2908 = vmatmul.mubr.bf16.gmra.mxu0 %v2319_v24 }
 0x635   : > { %v2643_v55 = vpop.f32.mrf.mxu0  ;;  %v2746_v11 = vpop.f32.mrf.mxu1 }
 0x637   : > { %v2645_v34 = vpop.f32.mrf.mxu0  ;;  %v2748_v35 = vpop.f32.mrf.mxu1 }
 0x639   : > { %v2647_v36 = vpop.f32.mrf.mxu0  ;;  %v2750_v37 = vpop.f32.mrf.mxu1 }
 0x63a   : > { %v2918_v38 = vpack.c.bf16 %v2647_v36, %v2643_v55  ;;  %v2920_v39 = vpack.c.bf16 %v2750_v37, %v2746_v11 }
 0x63b   : > { %v2649_v50 = vpop.f32.mrf.mxu0  ;;  %v2752_v43 = vpop.f32.mrf.mxu1 }
 0x63c   : > { %v3050_v45 = vadd.bf16 %v5349_v58, %v2918_v38  ;;  %v3052_v3 = vadd.bf16 %v5352_v60, %v2920_v39  ;;  %v2919_v52 = vpack.c.bf16 %v2649_v50, %v2645_v34  ;;  %v2921_v54 = vpack.c.bf16 %v2752_v43, %v2748_v35 }
 0x63d   : > { %v2653_v5 = vpop.f32.mrf.mxu0  ;;  %v2756_v7 = vpop.f32.mrf.mxu1 }
 0x63e   : > { %4445 = vtanh.bf16 %v3050_v45  ;;  %v3051_v8 = vadd.bf16 %v5355_v41, %v2919_v52  ;;  %v3053_v9 = vadd.bf16 %v5358_v48, %v2921_v54 }
 0x63f   : > { %4447 = vtanh.bf16 %v3052_v3  ;;  %v2655_v10 = vpop.f32.mrf.mxu0  ;;  %v2758_v12 = vpop.f32.mrf.mxu1 }
 0x640   : > { %4449 = vtanh.bf16 %v3051_v8 }
 0x641   : > { %4451 = vtanh.bf16 %v3053_v9  ;;  %v2657_v61 = vpop.f32.mrf.mxu0  ;;  %v2760_v63 = vpop.f32.mrf.mxu1 }
 0x642   : > { %v2924_v13 = vpack.c.bf16 %v2657_v61, %v2653_v5  ;;  %v2926_v14 = vpack.c.bf16 %v2760_v63, %v2756_v7 }
 0x643   : > { %v2659_v47 = vpop.f32.mrf.mxu0  ;;  %v2762_v0 = vpop.f32.mrf.mxu1 }
 0x644   : > { %v3056_v57 = vadd.bf16 %v5349_v58, %v2924_v13  ;;  %v3058_v59 = vadd.bf16 %v5352_v60, %v2926_v14  ;;  %v2925_v62 = vpack.c.bf16 %v2659_v47, %v2655_v10  ;;  %v2927_v1 = vpack.c.bf16 %v2762_v0, %v2758_v12 }
 0x645   : > { %v2663_v2 = vpop.f32.mrf.mxu0  ;;  %v2766_v31 = vpop.f32.mrf.mxu1 }
 0x646   : > { %4453 = vtanh.bf16 %v3056_v57  ;;  %v3057_v15 = vadd.bf16 %v5355_v41, %v2925_v62  ;;  %v3059_v51 = vadd.bf16 %v5358_v48, %v2927_v1 }
 0x647   : > { %4455 = vtanh.bf16 %v3058_v59  ;;  %v2665_v53 = vpop.f32.mrf.mxu0  ;;  %v2768_v16 = vpop.f32.mrf.mxu1 }
 0x648   : > { %4457 = vtanh.bf16 %v3057_v15 }
 0x649   : > { %4459 = vtanh.bf16 %v3059_v51  ;;  %v2667_v4 = vpop.f32.mrf.mxu0  ;;  %v2770_v17 = vpop.f32.mrf.mxu1 }
 0x64a   : > { %v2930_v49 = vpack.c.bf16 %v2667_v4, %v2663_v2  ;;  %v2932_v18 = vpack.c.bf16 %v2770_v17, %v2766_v31 }
 0x64b   : > { %v2669_v19 = vpop.f32.mrf.mxu0  ;;  %v2772_v20 = vpop.f32.mrf.mxu1 }
 0x64c   : > { %v4446_v23 = vpop.eup %4445  ;;  %v3062_v24 = vadd.bf16 %v5349_v58, %v2930_v49  ;;  %v3064_v22 = vadd.bf16 %v5352_v60, %v2932_v18  ;;  %v2931_v25 = vpack.c.bf16 %v2669_v19, %v2665_v53  ;;  %v2933_v26 = vpack.c.bf16 %v2772_v20, %v2768_v16 }
 0x64d   : > { %v4448_v27 = vpop.eup %4447  ;;  %v2673_v28 = vpop.f32.mrf.mxu0 }
 0x64e   : > { %v2776_v29 = vpop.f32.mrf.mxu1  ;;  %v4450_v6 = vpop.eup %4449  ;;  %4461 = vtanh.bf16 %v3062_v24  ;;  %v3063_v44 = vadd.bf16 %v5355_v41, %v2931_v25  ;;  %v3065_v46 = vadd.bf16 %v5358_v48, %v2933_v26 }
 0x64f   : > { %v4452_v30 = vpop.eup %4451  ;;  %v3697_v32 = vcombine.low %v4446_v23, %v4450_v6  ;;  %v3700_v55 = vcombine.high %v4446_v23, %v4450_v6  ;;  %4463 = vtanh.bf16 %v3064_v22  ;;  %v2675_v11 = vpop.f32.mrf.mxu0  ;;  %v2961_v22 = vcombine.high %v5342_v42, %v5342_v42 }
 0x650   : > { %v2778_v56 = vpop.f32.mrf.mxu1  ;;  %v3698_v33 = vcombine.low %v4448_v27, %v4452_v30  ;;  %v3701_v34 = vcombine.high %v4448_v27, %v4452_v30  ;;  %4465 = vtanh.bf16 %v3063_v44 }
 0x651   : > { %3344 = vst [vmem:[%s5374_s17] sm:$0xff] %v3697_v32  ;;  %3347 = vst [vmem:[%s5374_s17 + $0x18] sm:$0xff] %v3700_v55  ;;  %4467 = vtanh.bf16 %v3065_v46  ;;  %v2677_v35 = vpop.f32.mrf.mxu0  ;;  %v2975_v42 = vrot.slane %v2961_v22, %v5337_v40 }
 0x652   : > { %v2780_v36 = vpop.f32.mrf.mxu1  ;;  %3345 = vst [vmem:[%s5374_s17 + $0x8] sm:$0xff] %v3698_v33  ;;  %3348 = vst [vmem:[%s5374_s17 + $0x20] sm:$0xff] %v3701_v34  ;;  %v2936_v37 = vpack.c.bf16 %v2677_v35, %v2673_v28 }
 0x653   : > { %v2938_v38 = vpack.c.bf16 %v2780_v36, %v2776_v29  ;;  %v2679_v39 = vpop.f32.mrf.mxu0 }
 0x654   : > { %v2782_v50 = vpop.f32.mrf.mxu1  ;;  %v4454_v43 = vpop.eup %4453  ;;  %v3068_v45 = vadd.bf16 %v5349_v58, %v2936_v37  ;;  %v2937_v52 = vpack.c.bf16 %v2679_v39, %v2675_v11 }
 0x655   : > { %v3070_v3 = vadd.bf16 %v5352_v60, %v2938_v38  ;;  %v2939_v54 = vpack.c.bf16 %v2782_v50, %v2778_v56  ;;  %v4456_v5 = vpop.eup %4455  ;;  %v2683_v7 = vpop.f32.mrf.mxu0 }
 0x656   : > { %v2786_v8 = vpop.f32.mrf.mxu1  ;;  %v4458_v9 = vpop.eup %4457  ;;  %4469 = vtanh.bf16 %v3068_v45  ;;  %v3069_v10 = vadd.bf16 %v5355_v41, %v2937_v52  ;;  %v2977_v52 = vcombine.high %v2975_v42, %v2975_v42 }
 0x657   : > { %v3071_v12 = vadd.bf16 %v5358_v48, %v2939_v54  ;;  %v4460_v61 = vpop.eup %4459  ;;  %v3703_v63 = vcombine.low %v4454_v43, %v4458_v9  ;;  %v3706_v13 = vcombine.high %v4454_v43, %v4458_v9  ;;  %4471 = vtanh.bf16 %v3070_v3  ;;  %v2685_v14 = vpop.f32.mrf.mxu0 }
 0x658   : > { %v2788_v47 = vpop.f32.mrf.mxu1  ;;  %v3704_v0 = vcombine.low %v4456_v5, %v4460_v61  ;;  %v3707_v57 = vcombine.high %v4456_v5, %v4460_v61  ;;  %4473 = vtanh.bf16 %v3069_v10  ;;  %v2991_v10 = vrot.slane %v2975_v42, %v5337_v40 }
 0x659   : > { %3350 = vst [vmem:[%s5374_s17 + $0x30] sm:$0xff] %v3703_v63  ;;  %3353 = vst [vmem:[%s5374_s17 + $0x48] sm:$0xff] %v3706_v13  ;;  %4475 = vtanh.bf16 %v3071_v12  ;;  %v2687_v59 = vpop.f32.mrf.mxu0 }
 0x65a   : > { %v2790_v62 = vpop.f32.mrf.mxu1  ;;  %3351 = vst [vmem:[%s5374_s17 + $0x38] sm:$0xff] %v3704_v0  ;;  %3354 = vst [vmem:[%s5374_s17 + $0x50] sm:$0xff] %v3707_v57  ;;  %v2942_v1 = vpack.c.bf16 %v2687_v59, %v2683_v7  ;;  %v3005_v0 = vrot.slane %v2977_v52, %v5337_v40 }
 0x65b   : > { %v2944_v2 = vpack.c.bf16 %v2790_v62, %v2786_v8  ;;  %v2689_v31 = vpop.f32.mrf.mxu0  ;;  %v3037_v62 = vpack.i.b16 %v2991_v10, %v2991_v10 }
 0x65c   : > { %v2792_v15 = vpop.f32.mrf.mxu1  ;;  %v4462_v51 = vpop.eup %4461  ;;  %v3074_v53 = vadd.bf16 %v5349_v58, %v2942_v1  ;;  %v2943_v4 = vpack.c.bf16 %v2689_v31, %v2685_v14 }
 0x65d   : > { %v3076_v16 = vadd.bf16 %v5352_v60, %v2944_v2  ;;  %v2945_v17 = vpack.c.bf16 %v2792_v15, %v2788_v47  ;;  %v4464_v49 = vpop.eup %4463  ;;  %v2693_v18 = vpop.f32.mrf.mxu0 }
 0x65e   : > { %v2796_v19 = vpop.f32.mrf.mxu1  ;;  %v4466_v20 = vpop.eup %4465  ;;  %4477 = vtanh.bf16 %v3074_v53  ;;  %v3075_v23 = vadd.bf16 %v5355_v41, %v2943_v4 }
 0x65f   : > { %v3077_v24 = vadd.bf16 %v5358_v48, %v2945_v17  ;;  %v4468_v25 = vpop.eup %4467  ;;  %v3709_v26 = vcombine.low %v4462_v51, %v4466_v20  ;;  %v3712_v27 = vcombine.high %v4462_v51, %v4466_v20  ;;  %4479 = vtanh.bf16 %v3076_v16  ;;  %v2695_v28 = vpop.f32.mrf.mxu0 }
 0x660   : > { %v2798_v29 = vpop.f32.mrf.mxu1  ;;  %v3710_v6 = vcombine.low %v4464_v49, %v4468_v25  ;;  %v3713_v44 = vcombine.high %v4464_v49, %v4468_v25  ;;  %4481 = vtanh.bf16 %v3075_v23  ;;  %v3044_v49 = vpack.i.b16 %v3005_v0, %v3005_v0 }
 0x661   : > { %3356 = vst [vmem:[%s5374_s17 + $0x60] sm:$0xff] %v3709_v26  ;;  %3359 = vst [vmem:[%s5374_s17 + $0x78] sm:$0xff] %v3712_v27  ;;  %4483 = vtanh.bf16 %v3077_v24  ;;  %v2697_v46 = vpop.f32.mrf.mxu0  ;;  %v5414_v24 = vrot.slane %v3037_v62, %v5070_v21 }
 0x662   : > { %v2800_v30 = vpop.f32.mrf.mxu1  ;;  %3357 = vst [vmem:[%s5374_s17 + $0x68] sm:$0xff] %v3710_v6  ;;  %3360 = vst [vmem:[%s5374_s17 + $0x80] sm:$0xff] %v3713_v44  ;;  %v2948_v32 = vpack.c.bf16 %v2697_v46, %v2693_v18  ;;  %v5421_v22 = vrot.slane %v3044_v49, %v5070_v21 }
 0x663   : > { %v2950_v55 = vpack.c.bf16 %v2800_v30, %v2796_v19  ;;  %v2699_v11 = vpop.f32.mrf.mxu0 }
 0x664   : > { %v2802_v56 = vpop.f32.mrf.mxu1  ;;  %v4470_v33 = vpop.eup %4469  ;;  %v3080_v34 = vadd.bf16 %v5349_v58, %v2948_v32  ;;  %v2949_v36 = vpack.c.bf16 %v2699_v11, %v2695_v28 }
 0x665   : > { %v3082_v35 = vadd.bf16 %v5352_v60, %v2950_v55  ;;  %v2951_v37 = vpack.c.bf16 %v2802_v56, %v2798_v29  ;;  %v4472_v38 = vpop.eup %4471  ;;  %v2703_v39 = vpop.f32.mrf.mxu0 }
 0x666   : > { %v2806_v50 = vpop.f32.mrf.mxu1  ;;  %v4474_v43 = vpop.eup %4473  ;;  %4485 = vtanh.bf16 %v3080_v34  ;;  %v3081_v45 = vadd.bf16 %v5355_v41, %v2949_v36 }
 0x667   : > { %v3083_v3 = vadd.bf16 %v5358_v48, %v2951_v37  ;;  %v4476_v54 = vpop.eup %4475  ;;  %v3715_v5 = vcombine.low %v4470_v33, %v4474_v43  ;;  %v3718_v7 = vcombine.high %v4470_v33, %v4474_v43  ;;  %4487 = vtanh.bf16 %v3082_v35  ;;  %v2705_v8 = vpop.f32.mrf.mxu0 }
 0x668   : > { %v2808_v9 = vpop.f32.mrf.mxu1  ;;  %v3716_v12 = vcombine.low %v4472_v38, %v4476_v54  ;;  %v3719_v61 = vcombine.high %v4472_v38, %v4476_v54  ;;  %4489 = vtanh.bf16 %v3081_v45 }
 0x669   : > { %3362 = vst [vmem:[%s5374_s17 + $0x90] sm:$0xff] %v3715_v5  ;;  %3365 = vst [vmem:[%s5374_s17 + $0xa8] sm:$0xff] %v3718_v7  ;;  %4491 = vtanh.bf16 %v3083_v3  ;;  %v2707_v63 = vpop.f32.mrf.mxu0 }
 0x66a   : > { %v2810_v13 = vpop.f32.mrf.mxu1  ;;  %3363 = vst [vmem:[%s5374_s17 + $0x98] sm:$0xff] %v3716_v12  ;;  %3366 = vst [vmem:[%s5374_s17 + $0xb0] sm:$0xff] %v3719_v61  ;;  %v2954_v14 = vpack.c.bf16 %v2707_v63, %v2703_v39 }
 0x66b   : > { %v2956_v47 = vpack.c.bf16 %v2810_v13, %v2806_v50  ;;  %v2709_v57 = vpop.f32.mrf.mxu0 }
 0x66c   : > { %v2812_v59 = vpop.f32.mrf.mxu1  ;;  %v4478_v1 = vpop.eup %4477  ;;  %v3086_v2 = vadd.bf16 %v5349_v58, %v2954_v14  ;;  %v2955_v15 = vpack.c.bf16 %v2709_v57, %v2705_v8 }
 0x66d   : > { %v3088_v31 = vadd.bf16 %v5352_v60, %v2956_v47  ;;  %v2957_v51 = vpack.c.bf16 %v2812_v59, %v2808_v9  ;;  %v4480_v53 = vpop.eup %4479  ;;  %v2849_v16 = vpop.f32.mrf.mxu0 }
 0x66e   : > { %v4482_v4 = vpop.eup %4481  ;;  %4493 = vtanh.bf16 %v3086_v2  ;;  %v3087_v17 = vadd.bf16 %v5355_v41, %v2955_v15 }
 0x66f   : > { %v3089_v40 = vadd.bf16 %v5358_v48, %v2957_v51  ;;  %v4484_v18 = vpop.eup %4483  ;;  %v3721_v19 = vcombine.low %v4478_v1, %v4482_v4  ;;  %v3724_v58 = vcombine.high %v4478_v1, %v4482_v4  ;;  %4495 = vtanh.bf16 %v3088_v31  ;;  %v2851_v60 = vpop.f32.mrf.mxu0 }
 0x670   : > { %v3722_v20 = vcombine.low %v4480_v53, %v4484_v18  ;;  %v3725_v23 = vcombine.high %v4480_v53, %v4484_v18  ;;  %4497 = vtanh.bf16 %v3087_v17 }
 0x671   : > { %3368 = vst [vmem:[%s5374_s17 + $0xc0] sm:$0xff] %v3721_v19  ;;  %3371 = vst [vmem:[%s5374_s17 + $0xd8] sm:$0xff] %v3724_v58  ;;  %4499 = vtanh.bf16 %v3089_v40  ;;  %v2853_v41 = vpop.f32.mrf.mxu0 }
 0x672   : > { %3369 = vst [vmem:[%s5374_s17 + $0xc8] sm:$0xff] %v3722_v20  ;;  %3372 = vst [vmem:[%s5374_s17 + $0xe0] sm:$0xff] %v3725_v23  ;;  %v2922_v48 = vpack.c.bf16 %v2853_v41, %v2849_v16 }
 0x673   : > { %v2855_v25 = vpop.f32.mrf.mxu0 }
 0x674   : > { %v4486_v26 = vpop.eup %4485  ;;  %v3054_v27 = vadd.bf16 %v5414_v24, %v2922_v48  ;;  %v2923_v28 = vpack.c.bf16 %v2855_v25, %v2851_v60 }
 0x675   : > { %v4488_v29 = vpop.eup %4487  ;;  %v2859_v6 = vpop.f32.mrf.mxu0 }
 0x676   : > { %v4490_v44 = vpop.eup %4489  ;;  %v3055_v46 = vadd.bf16 %v5421_v22, %v2923_v28  ;;  %4501 = vtanh.bf16 %v3054_v27 }
 0x677   : > { %v4492_v30 = vpop.eup %4491  ;;  %v3727_v32 = vcombine.low %v4486_v26, %v4490_v44  ;;  %v3730_v55 = vcombine.high %v4486_v26, %v4490_v44  ;;  %v2861_v21 = vpop.f32.mrf.mxu0 }
 0x678   : > { %v3728_v42 = vcombine.low %v4488_v29, %v4492_v30  ;;  %v3731_v11 = vcombine.high %v4488_v29, %v4492_v30  ;;  %4503 = vtanh.bf16 %v3055_v46 }
 0x679   : > { %3374 = vst [vmem:[%s5374_s17 + $0xf0] sm:$0xff] %v3727_v32  ;;  %3377 = vst [vmem:[%s5374_s17 + $0x108] sm:$0xff] %v3730_v55  ;;  %v2863_v56 = vpop.f32.mrf.mxu0 }
 0x67a   : > { %3375 = vst [vmem:[%s5374_s17 + $0xf8] sm:$0xff] %v3728_v42  ;;  %3378 = vst [vmem:[%s5374_s17 + $0x110] sm:$0xff] %v3731_v11  ;;  %v2928_v33 = vpack.c.bf16 %v2863_v56, %v2859_v6 }
 0x67b   : > { %v2865_v34 = vpop.f32.mrf.mxu0 }
 0x67c   : > { %v4494_v35 = vpop.eup %4493  ;;  %v3060_v36 = vadd.bf16 %v5414_v24, %v2928_v33  ;;  %v2929_v37 = vpack.c.bf16 %v2865_v34, %v2861_v21 }
 0x67d   : > { %v4496_v38 = vpop.eup %4495  ;;  %v2869_v39 = vpop.f32.mrf.mxu0 }
 0x67e   : > { %v4498_v50 = vpop.eup %4497  ;;  %v3061_v43 = vadd.bf16 %v5421_v22, %v2929_v37  ;;  %4505 = vtanh.bf16 %v3060_v36 }
 0x67f   : > { %v4500_v45 = vpop.eup %4499  ;;  %v3733_v3 = vcombine.low %v4494_v35, %v4498_v50  ;;  %v3736_v52 = vcombine.high %v4494_v35, %v4498_v50  ;;  %v2871_v54 = vpop.f32.mrf.mxu0 }
 0x680   : > { %v3734_v5 = vcombine.low %v4496_v38, %v4500_v45  ;;  %v3737_v7 = vcombine.high %v4496_v38, %v4500_v45  ;;  %4507 = vtanh.bf16 %v3061_v43 }
 0x681   : > { %3380 = vst [vmem:[%s5374_s17 + $0x120] sm:$0xff] %v3733_v3  ;;  %3383 = vst [vmem:[%s5374_s17 + $0x138] sm:$0xff] %v3736_v52  ;;  %v2873_v8 = vpop.f32.mrf.mxu0 }
 0x682   : > { %3381 = vst [vmem:[%s5374_s17 + $0x128] sm:$0xff] %v3734_v5  ;;  %3384 = vst [vmem:[%s5374_s17 + $0x140] sm:$0xff] %v3737_v7  ;;  %v2934_v9 = vpack.c.bf16 %v2873_v8, %v2869_v39 }
 0x683   : > { %v2875_v10 = vpop.f32.mrf.mxu0 }
 0x684   : > { %v3066_v12 = vadd.bf16 %v5414_v24, %v2934_v9  ;;  %v2935_v61 = vpack.c.bf16 %v2875_v10, %v2871_v54  ;;  %v4502_v63 = vpop.eup %4501 }
 0x685   : > { %v2879_v13 = vpop.f32.mrf.mxu0 }
 0x686   : > { %v4504_v14 = vpop.eup %4503  ;;  %v3067_v47 = vadd.bf16 %v5421_v22, %v2935_v61  ;;  %4509 = vtanh.bf16 %v3066_v12 }
 0x687   : > { %v3699_v0 = vcombine.low %v4502_v63, %v4504_v14  ;;  %v3702_v57 = vcombine.high %v4502_v63, %v4504_v14  ;;  %v2881_v59 = vpop.f32.mrf.mxu0 }
 0x688   : > { %4511 = vtanh.bf16 %v3067_v47 }
 0x689   : > { %3346 = vst [vmem:[%s5374_s17 + $0x10] sm:$0xff] %v3699_v0  ;;  %3349 = vst [vmem:[%s5374_s17 + $0x28] sm:$0xff] %v3702_v57  ;;  %v2883_v62 = vpop.f32.mrf.mxu0 }
 0x68a   : > { %v2940_v1 = vpack.c.bf16 %v2883_v62, %v2879_v13 }
 0x68b   : > { %v2885_v2 = vpop.f32.mrf.mxu0 }
 0x68c   : > { %v3072_v31 = vadd.bf16 %v5414_v24, %v2940_v1  ;;  %v2941_v15 = vpack.c.bf16 %v2885_v2, %v2881_v59  ;;  %v4506_v51 = vpop.eup %4505 }
 0x68d   : > { %v2889_v53 = vpop.f32.mrf.mxu0 }
 0x68e   : > { %v4508_v16 = vpop.eup %4507  ;;  %v3073_v4 = vadd.bf16 %v5421_v22, %v2941_v15  ;;  %4513 = vtanh.bf16 %v3072_v31 }
 0x68f   : > { %v3705_v17 = vcombine.low %v4506_v51, %v4508_v16  ;;  %v3708_v40 = vcombine.high %v4506_v51, %v4508_v16  ;;  %v2891_v49 = vpop.f32.mrf.mxu0 }
 0x690   : > { %4515 = vtanh.bf16 %v3073_v4 }
 0x691   : > { %3352 = vst [vmem:[%s5374_s17 + $0x40] sm:$0xff] %v3705_v17  ;;  %3355 = vst [vmem:[%s5374_s17 + $0x58] sm:$0xff] %v3708_v40  ;;  %v2893_v18 = vpop.f32.mrf.mxu0 }
 0x692   : > { %v2946_v19 = vpack.c.bf16 %v2893_v18, %v2889_v53 }
 0x693   : > { %v2895_v58 = vpop.f32.mrf.mxu0 }
 0x694   : > { %v3078_v60 = vadd.bf16 %v5414_v24, %v2946_v19  ;;  %v2947_v20 = vpack.c.bf16 %v2895_v58, %v2891_v49  ;;  %v4510_v23 = vpop.eup %4509 }
 0x695   : > { %v2899_v41 = vpop.f32.mrf.mxu0 }
 0x696   : > { %v4512_v48 = vpop.eup %4511  ;;  %v3079_v25 = vadd.bf16 %v5421_v22, %v2947_v20  ;;  %4517 = vtanh.bf16 %v3078_v60 }
 0x697   : > { %v3711_v26 = vcombine.low %v4510_v23, %v4512_v48  ;;  %v3714_v27 = vcombine.high %v4510_v23, %v4512_v48  ;;  %v2901_v28 = vpop.f32.mrf.mxu0 }
 0x698   : > { %4519 = vtanh.bf16 %v3079_v25 }
 0x699   : > { %3358 = vst [vmem:[%s5374_s17 + $0x70] sm:$0xff] %v3711_v26  ;;  %3361 = vst [vmem:[%s5374_s17 + $0x88] sm:$0xff] %v3714_v27  ;;  %v2903_v29 = vpop.f32.mrf.mxu0 }
 0x69a   : > { %v2952_v6 = vpack.c.bf16 %v2903_v29, %v2899_v41 }
 0x69b   : > { %v2905_v44 = vpop.f32.mrf.mxu0 }
 0x69c   : > { %v3084_v46 = vadd.bf16 %v5414_v24, %v2952_v6  ;;  %v2953_v30 = vpack.c.bf16 %v2905_v44, %v2901_v28  ;;  %v4514_v32 = vpop.eup %4513 }
 0x69d   : > { %v2909_v55 = vpop.f32.mrf.mxu0 }
 0x69e   : > { %v4516_v21 = vpop.eup %4515  ;;  %v3085_v42 = vadd.bf16 %v5421_v22, %v2953_v30  ;;  %4521 = vtanh.bf16 %v3084_v46 }
 0x69f   : > { %v3717_v11 = vcombine.low %v4514_v32, %v4516_v21  ;;  %v3720_v56 = vcombine.high %v4514_v32, %v4516_v21  ;;  %v2911_v33 = vpop.f32.mrf.mxu0 }
 0x6a0   : > { %4523 = vtanh.bf16 %v3085_v42 }
 0x6a1   : > { %3364 = vst [vmem:[%s5374_s17 + $0xa0] sm:$0xff] %v3717_v11  ;;  %3367 = vst [vmem:[%s5374_s17 + $0xb8] sm:$0xff] %v3720_v56  ;;  %v2913_v34 = vpop.f32.mrf.mxu0 }
 0x6a2   : > { %v2958_v35 = vpack.c.bf16 %v2913_v34, %v2909_v55 }
 0x6a3   : > { %v2915_v36 = vpop.f32.mrf.mxu0 }
 0x6a4   : > { %v3090_v37 = vadd.bf16 %v5414_v24, %v2958_v35  ;;  %v2959_v38 = vpack.c.bf16 %v2915_v36, %v2911_v33  ;;  %v4518_v39 = vpop.eup %4517 }
 0x6a6   : > { %v4520_v50 = vpop.eup %4519  ;;  %v3091_v43 = vadd.bf16 %v5421_v22, %v2959_v38  ;;  %4525 = vtanh.bf16 %v3090_v37 }
 0x6a7   : > { %v3723_v45 = vcombine.low %v4518_v39, %v4520_v50  ;;  %v3726_v3 = vcombine.high %v4518_v39, %v4520_v50 }
 0x6a8   : > { %4527 = vtanh.bf16 %v3091_v43 }
 0x6a9   : > { %3370 = vst [vmem:[%s5374_s17 + $0xd0] sm:$0xff] %v3723_v45  ;;  %3373 = vst [vmem:[%s5374_s17 + $0xe8] sm:$0xff] %v3726_v3 }
 0x6ac   : > { %v4522_v52 = vpop.eup %4521 }
 0x6ae   : > { %v4524_v54 = vpop.eup %4523 }
 0x6af   : > { %v3729_v5 = vcombine.low %v4522_v52, %v4524_v54  ;;  %v3732_v7 = vcombine.high %v4522_v52, %v4524_v54 }
 0x6b1   : > { %3376 = vst [vmem:[%s5374_s17 + $0x100] sm:$0xff] %v3729_v5  ;;  %3379 = vst [vmem:[%s5374_s17 + $0x118] sm:$0xff] %v3732_v7 }
 0x6b4   : > { %v4526_v24 = vpop.eup %4525 }
 0x6b5   : > { %3393 = sbr.rel (!%p5567_p10) target bundleno = 1751 (0x6d7), region = 96 }
 0x6b6   : > { %v4528_v8 = vpop.eup %4527 }
 0x6b7   : > { %v3735_v9 = vcombine.low %v4526_v24, %v4528_v8  ;;  %v3738_v10 = vcombine.high %v4526_v24, %v4528_v8 }
 0x6b9   : > { %3382 = vst [vmem:[%s5374_s17 + $0x130] sm:$0xff] %v3735_v9  ;;  %3385 = vst [vmem:[%s5374_s17 + $0x148] sm:$0xff] %v3738_v10 }
 0x6ba   : > { %s5580_s28 = smov (!%p3396_p1, %s3395_s28), 14 }
 0x6bb   : > { %s5463_s16 = smul.u32 384, %s5580_s28 }
 0x6bd   : > { %s3401_s25 = ssub.s32 5376, %s5463_s16 }
 0x6be   : > { %3402 = vsyncadd %s3387_s10, %s3401_s25  ;;  %p3741_p3 = scmp.ne.s32.totalorder %s5463_s16, 0  ;;  %s4195_s27 = smul.u32 5376, %s4794_s22 }
 0x6bf   : > { %s3408_s18 = sshll.u32 %s5374_s17, 4  ;;  %s5568_s14 = sld [smem:[#allocation20_spill]]  ;;  %s5476_s18 = int_to_ptr.vmem [resolvable:$true] %s3408_s18 }
 0x6c0   : > { %s4607_s29 = scalar_lea.vmem %s5476_s18, %s5463_s16  ;;  %s4690_s23 = smov [#allocation8]  }
 0x6c1   : > { %p4608_p7 = scmp.ne.s32.totalorder %s5476_s18, %s4607_s29  ;;  %s4611_s12 = sshll.u32 %s4690_s23, 4  ;;  %s4612_s12 = int_to_ptr.vmem [resolvable:$false] %s4611_s12 }
 0x6c2   : > { %s4613_s22 = scalar_lea.vmem %s4612_s12, 10752  ;;  %p4614_p4 = scmp.lt.s32.totalorder %s5476_s18, %s4612_s12 }
 0x6c3   : > { %p4609_p9 = pnand %p4608_p7, %p3741_p3  ;;  %p4615_p6 = scmp.lt.s32.totalorder %s4613_s22, %s4607_s29 }
 0x6c5   : > { %s5474_s24 = scalar_lea.hbm %s5568_s14, %s4195_s27  ;;  %p4610_p12 = pneg %p4609_p9 }
 0x6c6   : > { %p4616_p11 = por %p4615_p6, %p4614_p4 }
 0x6c8   : > { %p4617_p0 = pnand %p4616_p11, %p4610_p12 }
 0x6ca   : > { %4620 = shalt.err (!%p4617_p0)
}
 0x6cb   : > { %s4621_s17 = scalar_lea.hbm %s5474_s24, %s5463_s16  ;;  %s4625_s27 = scalar_lea.hbm %s5568_s14, 9600 }
 0x6cc   : > { %p4622_p2 = scmp.ne.s32.totalorder %s5474_s24, %s4621_s17  ;;  %p4626_p10 = scmp.lt.s32.totalorder %s5474_s24, %s5568_s14 }
 0x6cd   : > { %p4627_p1 = scmp.lt.s32.totalorder %s4625_s27, %s4621_s17 }
 0x6ce   : > { %p4623_p5 = pnand %p4622_p2, %p3741_p3 }
 0x6cf   : > { %p4628_p7 = por %p4627_p1, %p4626_p10 }
 0x6d0   : > { %p4624_p13 = pneg %p4623_p5 }
 0x6d2   : > { %p4629_p9 = pnand %p4628_p7, %p4624_p13 }
 0x6d4   : > { %4632 = shalt.err (!%p4629_p9)
}
 0x6d5   : > { %s4691_s29 = smov 384   ;;  %s4692_s23 = smov 24  }
 0x6d6   : > { %3414 = dma.vmem_to_hbm [thread:$0]  (%p3741_p3), %s5476_s18, %s5463_s16, %s5474_s24, %s3387_s10, %s4691_s29, %s4691_s29, %s4692_s23  }
 0x6d7 PF: > { %s5569_s12 = sld [smem:[#allocation12_spill]] }
 0x6d8   : > { %s5570_s22 = sld [smem:[#allocation16_spill]] }
 0x6dd   : > { %s3423_s28 = sand.u32 1, %s5569_s12  }
 0x6de   : > { %p5571_p12 = scmp.ne.s32.totalorder %s5570_s22, 0  ;;  %s3424_s17 = scalar_lea.sflag [#allocation4], %s3423_s28 }
 0x6e0   : > { %p4187_p4 = pnand %p3504_p8, %p5571_p12 }
 0x6e2   : > { %p4188_p6 = pneg %p4187_p4 }
 0x6e4   : > { %4658 = dma.done.wait (%p4188_p6), %s3424_s17, 5376  }
 0x6e5   : > { %4660 = vsyncadd (%p4188_p6), %s3424_s17, 4294961920  ;;  %s5572_s21 = sld [smem:[#allocation13_spill]]  ;;  %s5574_s18 = smov %s4667_s19 }
 0x6e6   : > { %s5573_s25 = sld [smem:[#allocation14_spill]]  ;;  %s5575_s19 = smov %s4671_s20 }
 0x6eb   : > { %p29_p11 = scmp.ge.s32.totalorder %s5572_s21, 4  }
 0x6ec   : > { %s5576_s20 = smov %s5573_s25 }
 0x6ed   :  { %31 = sbr.rel (!%p29_p11) target bundleno = 11 (0xb), region = 133 }
 0x6f2   :  { %3429 = vsyncpa [#allocation3], 1 }
 0x6f3   :  { %3431 = vsyncpa [#allocation3 + $0x1], 1 }
 0x6f4   :  { %3432 = vsyncpa [#allocation6], 1 }
 0x6f5   :  { %3433 = vsyncpa [#allocation4], 1 }
 0x6f6   :  { %3435 = vsyncpa [#allocation4 + $0x1], 1 }

</bundles_post_ra>
